<compile_context>
chip_gen: v6e
topology: v6e:2x2x1
jax: 0.10.0
libtpu: 0.0.40
codegen_flags: <defaults>
</compile_context>

<pallas_src>
import jax
import jax.numpy as jnp
from jax import lax
from jax.experimental import pallas as pl
from jax.experimental.pallas import tpu as pltpu

EPS = 1e-5  # nn.BatchNorm2d default eps


def _pick_row_tile(ho, max_rows=8):
    """Largest divisor of `ho` that is <= max_rows (every tile stays full)."""
    t = min(max_rows, ho)
    while ho % t:
        t -= 1
    return t


def make_wide_basic_kernel(H, W, Cin, Cout, stride, TH, has_shortcut):
    s = stride
    Ho = (H - 1) // s + 1
    Wo = (W - 1) // s + 1
    TH_in = (TH - 1) * s + 3          # rows of H-padded input needed per output row tile

    def kernel(x_ref,                 # (1, H+2, W, Cin) f32, zero-padded along H
               s1_ref, t1_ref,        # BN1 folded scale / shift          (1, Cin)  f32
               w1_ref, b1_ref,        # conv1 with BN2 folded in          (Cin, Cout) bf16 / (1, Cout) f32
               w2_ref, b2_ref,        # conv2 im2col weight               (9*Cout, Cout) bf16 / (1, Cout) f32
               *rest):
        if has_shortcut:
            ws_ref, bs_ref, out_ref, pad_ref = rest
        else:
            out_ref, pad_ref = rest

        r = pl.program_id(1)                          # row-tile index
        base = r * (TH * s)                           # first padded-x row of this tile
        if (TH * s) % 8 == 0:
            base = pl.multiple_of(base, 8)

        # ---- BN1 (precomputed scale/shift) + ReLU on the x row window --------
        xw = x_ref[0, pl.ds(base, TH_in), :, :]                       # (TH_in, W, Cin)
        h = jnp.maximum(xw * s1_ref[...] + t1_ref[...], 0.0)

        # ---- conv1 1x1 (+ folded BN2) + ReLU: one bf16 MXU matmul ------------
        t = jnp.dot(h.reshape(TH_in * W, Cin).astype(jnp.bfloat16), w1_ref[...],
                    preferred_element_type=jnp.float32) + b1_ref[...]
        # TODO(synk): nn.Dropout treated as identity (eval mode); training-mode
        #             stochastic masking is not implemented here.
        t = jnp.maximum(t, 0.0).reshape(TH_in, W, Cout)

        # rows of this window that fall in conv2's zero padding (above row 0 /
        # below row H-1) must contribute exact zeros
        g = base + lax.broadcasted_iota(jnp.int32, (TH_in, 1, 1), 0)  # padded row id
        t = jnp.where((g >= 1) & (g <= H), t, 0.0)

        # ---- stage the W-padded tile in VMEM (re-zero only the 1-px halo cols) --
        zcol = jnp.zeros((TH_in, 1, Cout), jnp.bfloat16)
        pad_ref[:, 0:1, :] = zcol
        pad_ref[:, W + 1:W + 2, :] = zcol
        pad_ref[:, 1:W + 1, :] = t.astype(jnp.bfloat16)

        # ---- conv2 3x3 / stride: im2col -> single MXU dot (K = 9*Cout) ----------
        cols = []
        for ky in range(3):
            for kx in range(3):
                if s == 1:
                    win = pad_ref[ky:ky + TH, kx:kx + Wo, :]
                else:
                    # NOTE: strided sublane reads; for stride-2 stages, pre-compacting
                    # the even rows/cols once would keep the vld slots unmasked.
                    win = pad_ref[pl.ds(ky, TH, s), pl.ds(kx, Wo, s), :]
                cols.append(win.reshape(TH * Wo, Cout))
        col = jnp.concatenate(cols, axis=-1)                           # (TH*Wo, 9*Cout) bf16
        y = jnp.dot(col, w2_ref[...],
                    preferred_element_type=jnp.float32) + b2_ref[...]  # (TH*Wo, Cout) f32

        # ---- shortcut ------------------------------------------------------------
        if s == 1:
            xs = x_ref[0, pl.ds(base + 1, TH), :, :]
        else:
            xs = x_ref[0, pl.ds(base + 1, TH, s), pl.ds(0, Wo, s), :]
        if has_shortcut:
            sc = jnp.dot(xs.reshape(TH * Wo, Cin).astype(jnp.bfloat16), ws_ref[...],
                         preferred_element_type=jnp.float32) + bs_ref[...]
        else:
            sc = xs.reshape(TH * Wo, Cout)        # identity shortcut: pure VPU add

        out_ref[0] = (y + sc).reshape(TH, Wo, Cout).astype(out_ref.dtype)

    return kernel, Ho, Wo, TH_in


def wide_basic_forward(x_nchw, params, stride=1, row_tile=8):
    """x_nchw: (N, Cin, H, W) f32 -> (N, Cout, Ho, Wo) f32 (torch wide_basic, eval)."""
    N, Cin, H, W = x_nchw.shape
    Cout = params["w1"].shape[1]
    has_shortcut = (stride != 1) or (Cin != Cout)
    f32, bf16 = jnp.float32, jnp.bfloat16

    # NHWC + 1-row zero halo along H (for conv2's padding=1)
    x = jnp.transpose(x_nchw, (0, 2, 3, 1)).astype(f32)
    x_p = jnp.pad(x, ((0, 0), (1, 1), (0, 0), (0, 0)))

    # ---- fold BN1 / BN2 into per-channel affine + conv1 weights (wrapper side) ---
    scale1 = (params["g1"] * lax.rsqrt(params["v1"] + EPS)).astype(f32)      # (1, Cin)
    shift1 = (params["be1"] - params["m1"] * scale1).astype(f32)             # (1, Cin)
    scale2 = params["g2"] * lax.rsqrt(params["v2"] + EPS)                    # (1, Cout)
    w1f = (params["w1"] * scale2).astype(bf16)                               # (Cin, Cout)
    b1f = ((params["cb1"] - params["m2"]) * scale2 + params["be2"]).astype(f32)
    w2m = params["w2"].reshape(9 * Cout, Cout).astype(bf16)                  # im2col layout
    b2 = params["cb2"].astype(f32)

    plist = [scale1, shift1, w1f, b1f, w2m, b2]
    if has_shortcut:
        plist += [params["ws"].astype(bf16), params["bs"].astype(f32)]

    Ho = (H - 1) // stride + 1
    TH = _pick_row_tile(Ho, row_tile)   # sweep upward (16-32) on v6e for big images
    kernel, Ho, Wo, TH_in = make_wide_basic_kernel(H, W, Cin, Cout, stride, TH,
                                                   has_shortcut)

    def param_spec(p):
        nd = p.ndim
        return pl.BlockSpec(p.shape, lambda n, r, _nd=nd: (0,) * _nd)

    out = pl.pallas_call(
        kernel,
        out_shape=jax.ShapeDtypeStruct((N, Ho, Wo, Cout), f32),
        grid=(N, Ho // TH),
        in_specs=[pl.BlockSpec((1, H + 2, W, Cin), lambda n, r: (n, 0, 0, 0))]
                 + [param_spec(p) for p in plist],
        out_specs=pl.BlockSpec((1, TH, Wo, Cout), lambda n, r: (n, r, 0, 0)),
        scratch_shapes=[pltpu.VMEM((TH_in, W + 2, Cout), bf16)],
        compiler_params=pltpu.CompilerParams(
            # batch and row-tile axes are both independent -> megacore friendly
            dimension_semantics=("parallel", "parallel"),
            # raise the scoped-VMEM budget above the 16/32 MiB defaults while
            # staying below v7x's 64 MiB physical VMEM
            vmem_limit_bytes=48 * 1024 * 1024,
        ),
    )(x_p, *plist)

    return jnp.transpose(out, (0, 3, 1, 2))   # back to NCHW


def init_params(key, in_planes, planes, stride):
    """Deterministic synthetic parameters matching the torch module's shapes."""
    ks = jax.random.split(key, 14)
    f = jnp.float32
    p = {}
    # bn1 (gamma, beta, running_mean, running_var) over in_planes
    p["g1"] = 1.0 + 0.1 * jax.random.normal(ks[0], (1, in_planes), f)
    p["be1"] = 0.1 * jax.random.normal(ks[1], (1, in_planes), f)
    p["m1"] = 0.1 * jax.random.normal(ks[2], (1, in_planes), f)
    p["v1"] = 0.9 + 0.2 * jax.random.uniform(ks[3], (1, in_planes), f)
    # conv1: torch weight (planes, in_planes, 1, 1) -> (in_planes, planes) matrix
    p["w1"] = 0.3 * jax.random.normal(ks[4], (in_planes, planes), f)
    p["cb1"] = 0.1 * jax.random.normal(ks[5], (1, planes), f)
    # bn2 over planes
    p["g2"] = 1.0 + 0.1 * jax.random.normal(ks[6], (1, planes), f)
    p["be2"] = 0.1 * jax.random.normal(ks[7], (1, planes), f)
    p["m2"] = 0.1 * jax.random.normal(ks[8], (1, planes), f)
    p["v2"] = 0.9 + 0.2 * jax.random.uniform(ks[9], (1, planes), f)
    # conv2: torch weight (planes, planes, 3, 3) -> HWIO (3, 3, planes, planes)
    p["w2"] = 0.2 * jax.random.normal(ks[10], (3, 3, planes, planes), f)
    p["cb2"] = 0.1 * jax.random.normal(ks[11], (1, planes), f)
    # shortcut 1x1 conv exists only when torch creates one
    if stride != 1 or in_planes != planes:
        p["ws"] = 0.3 * jax.random.normal(ks[12], (in_planes, planes), f)
        p["bs"] = 0.1 * jax.random.normal(ks[13], (1, planes), f)
    return p


def reference_f32(x_nchw, params, stride):
    """Pure-f32 XLA reference of the torch module's forward (eval mode)."""
    x = jnp.transpose(x_nchw, (0, 2, 3, 1)).astype(jnp.float32)
    h = (x - params["m1"]) * (params["g1"] * lax.rsqrt(params["v1"] + EPS)) + params["be1"]
    h = jnp.maximum(h, 0.0)
    t = jnp.einsum("nhwc,cd->nhwd", h, params["w1"]) + params["cb1"]
    t = (t - params["m2"]) * (params["g2"] * lax.rsqrt(params["v2"] + EPS)) + params["be2"]
    t = jnp.maximum(t, 0.0)
    y = lax.conv_general_dilated(
        t, params["w2"], (stride, stride), ((1, 1), (1, 1)),
        dimension_numbers=("NHWC", "HWIO", "NHWC")) + params["cb2"]
    xs = x[:, ::stride, ::stride, :]
    if "ws" in params:
        sc = jnp.einsum("nhwc,cd->nhwd", xs, params["ws"]) + params["bs"]
    else:
        sc = xs
    return jnp.transpose(y + sc, (0, 3, 1, 2))


def reference_bf16(x_nchw, params, stride):
    """Reference using the same bf16 operand rounding as the kernel (f32 accumulation)."""
    f32, bf16 = jnp.float32, jnp.bfloat16
    x = jnp.transpose(x_nchw, (0, 2, 3, 1)).astype(f32)
    s1 = params["g1"] * lax.rsqrt(params["v1"] + EPS)
    t1 = params["be1"] - params["m1"] * s1
    s2 = params["g2"] * lax.rsqrt(params["v2"] + EPS)
    w1f = (params["w1"] * s2).astype(bf16)
    b1f = (params["cb1"] - params["m2"]) * s2 + params["be2"]
    h = jnp.maximum(x * s1 + t1, 0.0).astype(bf16)
    t = jnp.einsum("nhwc,cd->nhwd", h, w1f, preferred_element_type=f32) + b1f
    t = jnp.maximum(t, 0.0).astype(bf16)
    y = lax.conv_general_dilated(
        t, params["w2"].astype(bf16), (stride, stride), ((1, 1), (1, 1)),
        dimension_numbers=("NHWC", "HWIO", "NHWC"),
        preferred_element_type=f32) + params["cb2"]
    xs = x[:, ::stride, ::stride, :]
    if "ws" in params:
        sc = jnp.einsum("nhwc,cd->nhwd", xs.astype(bf16), params["ws"].astype(bf16),
                        preferred_element_type=f32) + params["bs"]
    else:
        sc = xs
    return jnp.transpose(y + sc, (0, 3, 1, 2))


if __name__ == "__main__":
    N, H, W = 2, 16, 16
    configs = [
        # (in_planes, planes, stride)
        (4, 8, 1),   # channel-expanding block -> 1x1 conv shortcut
        (8, 8, 1),   # in == out, stride 1     -> identity shortcut (matmul skipped)
    ]
    key = jax.random.PRNGKey(0)
    for (cin, cout, stride) in configs:
        key, kx, kp = jax.random.split(key, 3)
        x = jax.random.normal(kx, (N, cin, H, W), jnp.float32)
        params = init_params(kp, cin, cout, stride)

        out = jax.block_until_ready(wide_basic_forward(x, params, stride=stride))
        ref_b = reference_bf16(x, params, stride)
        ref_f = reference_f32(x, params, stride)

        assert out.shape == ref_f.shape, (out.shape, ref_f.shape)
        # structural/indexing check vs a reference with identical bf16 operand rounding
        err_b = float(jnp.max(jnp.abs(out - ref_b)))
        assert err_b < 2e-3, f"bf16-matched max abs error {err_b}"
        # semantic check vs the pure-f32 torch forward (allows the bf16 quantization gap)
        err_f = float(jnp.max(jnp.abs(out - ref_f)))
        scale = float(jnp.max(jnp.abs(ref_f)))
        assert err_f < 0.05 * max(1.0, scale), f"f32 max abs error {err_f} (scale {scale})"

    print("KERNEL_OK")
</pallas_src>

<mosaic_0001>
module attributes {stable_mosaic.version = 11 : i64} {
  func.func @kernel(%arg0: i32, %arg1: i32, %arg2: memref<1x18x16x4xf32, #tpu.memory_space<vmem>>, %arg3: memref<1x4xf32, #tpu.memory_space<vmem>>, %arg4: memref<1x4xf32, #tpu.memory_space<vmem>>, %arg5: memref<4x8xbf16, #tpu.memory_space<vmem>>, %arg6: memref<1x8xf32, #tpu.memory_space<vmem>>, %arg7: memref<72x8xbf16, #tpu.memory_space<vmem>>, %arg8: memref<1x8xf32, #tpu.memory_space<vmem>>, %arg9: memref<4x8xbf16, #tpu.memory_space<vmem>>, %arg10: memref<1x8xf32, #tpu.memory_space<vmem>>, %arg11: memref<1x8x16x8xf32, #tpu.memory_space<vmem>>, %arg12: memref<10x18x8xbf16, #tpu.memory_space<vmem>>) attributes {dimension_semantics = [#tpu.dimension_semantics<parallel>, #tpu.dimension_semantics<parallel>], iteration_bounds = array<i64: 2, 2>, scalar_prefetch = 0 : i64, scratch_operands = 1 : i64, tpu.core_type = #tpu.core_type<tc>, window_params = [{transform_indices = @transform_0, window_bounds = array<i64: 1, 18, 16, 4>}, {pipeline_mode = #tpu.pipeline_mode<synchronous>, transform_indices = @transform_1, window_bounds = array<i64: 1, 4>}, {pipeline_mode = #tpu.pipeline_mode<synchronous>, transform_indices = @transform_2, window_bounds = array<i64: 1, 4>}, {pipeline_mode = #tpu.pipeline_mode<synchronous>, transform_indices = @transform_3, window_bounds = array<i64: 4, 8>}, {pipeline_mode = #tpu.pipeline_mode<synchronous>, transform_indices = @transform_4, window_bounds = array<i64: 1, 8>}, {pipeline_mode = #tpu.pipeline_mode<synchronous>, transform_indices = @transform_5, window_bounds = array<i64: 72, 8>}, {pipeline_mode = #tpu.pipeline_mode<synchronous>, transform_indices = @transform_6, window_bounds = array<i64: 1, 8>}, {pipeline_mode = #tpu.pipeline_mode<synchronous>, transform_indices = @transform_7, window_bounds = array<i64: 4, 8>}, {pipeline_mode = #tpu.pipeline_mode<synchronous>, transform_indices = @transform_8, window_bounds = array<i64: 1, 8>}, {transform_indices = @transform_9, window_bounds = array<i64: 1, 8, 16, 8>}]} {
    %c8_i32 = arith.constant 8 : i32
    %0 = arith.muli %arg1, %c8_i32 : i32
    %1 = tpu.assume_multiple %0, 8 : i32
    %c0 = arith.constant 0 : index
    %2 = arith.index_cast %1 : i32 to index
    %c0_0 = arith.constant 0 : index
    %c0_1 = arith.constant 0 : index
    %3 = vector.load %arg2[%c0, %2, %c0_0, %c0_1] : memref<1x18x16x4xf32, #tpu.memory_space<vmem>>, vector<1x10x16x4xf32>
    %4 = vector.shape_cast %3 : vector<1x10x16x4xf32> to vector<10x16x4xf32>
    %c0_2 = arith.constant 0 : index
    %c0_3 = arith.constant 0 : index
    %5 = vector.load %arg3[%c0_2, %c0_3] : memref<1x4xf32, #tpu.memory_space<vmem>>, vector<1x4xf32>
    %6 = vector.shape_cast %5 : vector<1x4xf32> to vector<1x1x4xf32>
    %7 = vector.broadcast %6 : vector<1x1x4xf32> to vector<10x16x4xf32>
    %8 = arith.mulf %4, %7 : vector<10x16x4xf32>
    %c0_4 = arith.constant 0 : index
    %c0_5 = arith.constant 0 : index
    %9 = vector.load %arg4[%c0_4, %c0_5] : memref<1x4xf32, #tpu.memory_space<vmem>>, vector<1x4xf32>
    %10 = vector.shape_cast %9 : vector<1x4xf32> to vector<1x1x4xf32>
    %11 = vector.broadcast %10 : vector<1x1x4xf32> to vector<10x16x4xf32>
    %12 = arith.addf %8, %11 : vector<10x16x4xf32>
    %cst = arith.constant 0.000000e+00 : f32
    %13 = vector.broadcast %cst : f32 to vector<10x16x4xf32>
    %14 = arith.maximumf %12, %13 : vector<10x16x4xf32>
    %15 = vector.shape_cast %14 : vector<10x16x4xf32> to vector<160x4xf32>
    %16 = arith.truncf %15 : vector<160x4xf32> to vector<160x4xbf16>
    %c0_6 = arith.constant 0 : index
    %c0_7 = arith.constant 0 : index
    %17 = vector.load %arg5[%c0_6, %c0_7] : memref<4x8xbf16, #tpu.memory_space<vmem>>, vector<4x8xbf16>
    %cst_8 = arith.constant dense<0.000000e+00> : vector<160x8xf32>
    %18 = tpu.matmul %16, %17, %cst_8 {dimension_numbers = #tpu.dot_dimension_numbers<[1], [0], [0], [1], [0, 0, 1, 1], [], []>} : vector<160x4xbf16>, vector<4x8xbf16>, vector<160x8xf32> -> vector<160x8xf32>
    %c0_9 = arith.constant 0 : index
    %c0_10 = arith.constant 0 : index
    %19 = vector.load %arg6[%c0_9, %c0_10] : memref<1x8xf32, #tpu.memory_space<vmem>>, vector<1x8xf32>
    %20 = vector.broadcast %19 : vector<1x8xf32> to vector<160x8xf32>
    %21 = arith.addf %18, %20 : vector<160x8xf32>
    %cst_11 = arith.constant 0.000000e+00 : f32
    %22 = vector.broadcast %cst_11 : f32 to vector<160x8xf32>
    %23 = arith.maximumf %21, %22 : vector<160x8xf32>
    %24 = vector.shape_cast %23 : vector<160x8xf32> to vector<10x16x8xf32>
    %25 = tpu.iota {dimensions = array<i32: 0>} : vector<10x1x1xi32>
    %26 = vector.broadcast %1 : i32 to vector<10x1x1xi32>
    %27 = arith.addi %26, %25 : vector<10x1x1xi32>
    %c1_i32 = arith.constant 1 : i32
    %28 = vector.broadcast %c1_i32 : i32 to vector<10x1x1xi32>
    %29 = arith.cmpi sge, %27, %28 : vector<10x1x1xi32>
    %c16_i32 = arith.constant 16 : i32
    %30 = vector.broadcast %c16_i32 : i32 to vector<10x1x1xi32>
    %31 = arith.cmpi sle, %27, %30 : vector<10x1x1xi32>
    %32 = arith.andi %29, %31 : vector<10x1x1xi1>
    %cst_12 = arith.constant 0.000000e+00 : f32
    %33 = vector.shape_cast %32 : vector<10x1x1xi1> to vector<10x1x1xi1>
    %34 = vector.broadcast %33 : vector<10x1x1xi1> to vector<10x16x8xi1>
    %35 = vector.broadcast %cst_12 : f32 to vector<10x16x8xf32>
    %36 = arith.select %34, %24, %35 : vector<10x16x8xi1>, vector<10x16x8xf32>
    %cst_13 = arith.constant 0.000000e+00 : bf16
    %37 = vector.broadcast %cst_13 : bf16 to vector<10x1x8xbf16>
    %c0_14 = arith.constant 0 : index
    %c0_15 = arith.constant 0 : index
    %c0_16 = arith.constant 0 : index
    %38 = vector.load %arg12[%c0_14, %c0_15, %c0_16] : memref<10x18x8xbf16, #tpu.memory_space<vmem>>, vector<10x1x8xbf16>
    tpu.vector_store %arg12[%c0_14, %c0_15, %c0_16], %37 {strides = array<i32>} : memref<10x18x8xbf16, #tpu.memory_space<vmem>>, vector<10x1x8xbf16>,
    %c0_17 = arith.constant 0 : index
    %c17 = arith.constant 17 : index
    %c0_18 = arith.constant 0 : index
    %39 = vector.load %arg12[%c0_17, %c17, %c0_18] : memref<10x18x8xbf16, #tpu.memory_space<vmem>>, vector<10x1x8xbf16>
    tpu.vector_store %arg12[%c0_17, %c17, %c0_18], %37 {strides = array<i32>} : memref<10x18x8xbf16, #tpu.memory_space<vmem>>, vector<10x1x8xbf16>,
    %40 = arith.truncf %36 : vector<10x16x8xf32> to vector<10x16x8xbf16>
    %c0_19 = arith.constant 0 : index
    %c1 = arith.constant 1 : index
    %c0_20 = arith.constant 0 : index
    %41 = vector.load %arg12[%c0_19, %c1, %c0_20] : memref<10x18x8xbf16, #tpu.memory_space<vmem>>, vector<10x16x8xbf16>
    tpu.vector_store %arg12[%c0_19, %c1, %c0_20], %40 {strides = array<i32>} : memref<10x18x8xbf16, #tpu.memory_space<vmem>>, vector<10x16x8xbf16>,
    %c0_21 = arith.constant 0 : index
    %c0_22 = arith.constant 0 : index
    %c0_23 = arith.constant 0 : index
    %42 = vector.load %arg12[%c0_21, %c0_22, %c0_23] : memref<10x18x8xbf16, #tpu.memory_space<vmem>>, vector<8x16x8xbf16>
    %43 = vector.shape_cast %42 : vector<8x16x8xbf16> to vector<128x8xbf16>
    %c0_24 = arith.constant 0 : index
    %c1_25 = arith.constant 1 : index
    %c0_26 = arith.constant 0 : index
    %44 = vector.load %arg12[%c0_24, %c1_25, %c0_26] : memref<10x18x8xbf16, #tpu.memory_space<vmem>>, vector<8x16x8xbf16>
    %45 = vector.shape_cast %44 : vector<8x16x8xbf16> to vector<128x8xbf16>
    %c0_27 = arith.constant 0 : index
    %c2 = arith.constant 2 : index
    %c0_28 = arith.constant 0 : index
    %46 = vector.load %arg12[%c0_27, %c2, %c0_28] : memref<10x18x8xbf16, #tpu.memory_space<vmem>>, vector<8x16x8xbf16>
    %47 = vector.shape_cast %46 : vector<8x16x8xbf16> to vector<128x8xbf16>
    %c1_29 = arith.constant 1 : index
    %c0_30 = arith.constant 0 : index
    %c0_31 = arith.constant 0 : index
    %48 = vector.load %arg12[%c1_29, %c0_30, %c0_31] : memref<10x18x8xbf16, #tpu.memory_space<vmem>>, vector<8x16x8xbf16>
    %49 = vector.shape_cast %48 : vector<8x16x8xbf16> to vector<128x8xbf16>
    %c1_32 = arith.constant 1 : index
    %c1_33 = arith.constant 1 : index
    %c0_34 = arith.constant 0 : index
    %50 = vector.load %arg12[%c1_32, %c1_33, %c0_34] : memref<10x18x8xbf16, #tpu.memory_space<vmem>>, vector<8x16x8xbf16>
    %51 = vector.shape_cast %50 : vector<8x16x8xbf16> to vector<128x8xbf16>
    %c1_35 = arith.constant 1 : index
    %c2_36 = arith.constant 2 : index
    %c0_37 = arith.constant 0 : index
    %52 = vector.load %arg12[%c1_35, %c2_36, %c0_37] : memref<10x18x8xbf16, #tpu.memory_space<vmem>>, vector<8x16x8xbf16>
    %53 = vector.shape_cast %52 : vector<8x16x8xbf16> to vector<128x8xbf16>
    %c2_38 = arith.constant 2 : index
    %c0_39 = arith.constant 0 : index
    %c0_40 = arith.constant 0 : index
    %54 = vector.load %arg12[%c2_38, %c0_39, %c0_40] : memref<10x18x8xbf16, #tpu.memory_space<vmem>>, vector<8x16x8xbf16>
    %55 = vector.shape_cast %54 : vector<8x16x8xbf16> to vector<128x8xbf16>
    %c2_41 = arith.constant 2 : index
    %c1_42 = arith.constant 1 : index
    %c0_43 = arith.constant 0 : index
    %56 = vector.load %arg12[%c2_41, %c1_42, %c0_43] : memref<10x18x8xbf16, #tpu.memory_space<vmem>>, vector<8x16x8xbf16>
    %57 = vector.shape_cast %56 : vector<8x16x8xbf16> to vector<128x8xbf16>
    %c2_44 = arith.constant 2 : index
    %c2_45 = arith.constant 2 : index
    %c0_46 = arith.constant 0 : index
    %58 = vector.load %arg12[%c2_44, %c2_45, %c0_46] : memref<10x18x8xbf16, #tpu.memory_space<vmem>>, vector<8x16x8xbf16>
    %59 = vector.shape_cast %58 : vector<8x16x8xbf16> to vector<128x8xbf16>
    %60 = tpu.concatenate %43, %45, %47, %49, %51, %53, %55, %57, %59 in 1 : vector<128x8xbf16>, vector<128x8xbf16>, vector<128x8xbf16>, vector<128x8xbf16>, vector<128x8xbf16>, vector<128x8xbf16>, vector<128x8xbf16>, vector<128x8xbf16>, vector<128x8xbf16> -> vector<128x72xbf16>
    %c0_47 = arith.constant 0 : index
    %c0_48 = arith.constant 0 : index
    %61 = vector.load %arg7[%c0_47, %c0_48] : memref<72x8xbf16, #tpu.memory_space<vmem>>, vector<72x8xbf16>
    %cst_49 = arith.constant dense<0.000000e+00> : vector<128x8xf32>
    %62 = tpu.matmul %60, %61, %cst_49 {dimension_numbers = #tpu.dot_dimension_numbers<[1], [0], [0], [1], [0, 0, 1, 1], [], []>} : vector<128x72xbf16>, vector<72x8xbf16>, vector<128x8xf32> -> vector<128x8xf32>
    %c0_50 = arith.constant 0 : index
    %c0_51 = arith.constant 0 : index
    %63 = vector.load %arg8[%c0_50, %c0_51] : memref<1x8xf32, #tpu.memory_space<vmem>>, vector<1x8xf32>
    %64 = vector.broadcast %63 : vector<1x8xf32> to vector<128x8xf32>
    %65 = arith.addf %62, %64 : vector<128x8xf32>
    %c1_i32_52 = arith.constant 1 : i32
    %66 = arith.addi %1, %c1_i32_52 : i32
    %c0_53 = arith.constant 0 : index
    %67 = arith.index_cast %66 : i32 to index
    %c0_54 = arith.constant 0 : index
    %c0_55 = arith.constant 0 : index
    %68 = vector.load %arg2[%c0_53, %67, %c0_54, %c0_55] : memref<1x18x16x4xf32, #tpu.memory_space<vmem>>, vector<1x8x16x4xf32>
    %69 = vector.shape_cast %68 : vector<1x8x16x4xf32> to vector<8x16x4xf32>
    %70 = vector.shape_cast %69 : vector<8x16x4xf32> to vector<128x4xf32>
    %71 = arith.truncf %70 : vector<128x4xf32> to vector<128x4xbf16>
    %c0_56 = arith.constant 0 : index
    %c0_57 = arith.constant 0 : index
    %72 = vector.load %arg9[%c0_56, %c0_57] : memref<4x8xbf16, #tpu.memory_space<vmem>>, vector<4x8xbf16>
    %cst_58 = arith.constant dense<0.000000e+00> : vector<128x8xf32>
    %73 = tpu.matmul %71, %72, %cst_58 {dimension_numbers = #tpu.dot_dimension_numbers<[1], [0], [0], [1], [0, 0, 1, 1], [], []>} : vector<128x4xbf16>, vector<4x8xbf16>, vector<128x8xf32> -> vector<128x8xf32>
    %c0_59 = arith.constant 0 : index
    %c0_60 = arith.constant 0 : index
    %74 = vector.load %arg10[%c0_59, %c0_60] : memref<1x8xf32, #tpu.memory_space<vmem>>, vector<1x8xf32>
    %75 = vector.broadcast %74 : vector<1x8xf32> to vector<128x8xf32>
    %76 = arith.addf %73, %75 : vector<128x8xf32>
    %77 = arith.addf %65, %76 : vector<128x8xf32>
    %78 = vector.shape_cast %77 : vector<128x8xf32> to vector<8x16x8xf32>
    %c0_61 = arith.constant 0 : index
    %c0_62 = arith.constant 0 : index
    %c0_63 = arith.constant 0 : index
    %c0_64 = arith.constant 0 : index
    %79 = vector.load %arg11[%c0_61, %c0_62, %c0_63, %c0_64] : memref<1x8x16x8xf32, #tpu.memory_space<vmem>>, vector<1x8x16x8xf32>
    %80 = vector.shape_cast %79 : vector<1x8x16x8xf32> to vector<8x16x8xf32>
    %81 = vector.shape_cast %78 : vector<8x16x8xf32> to vector<1x8x16x8xf32>
    tpu.vector_store %arg11[%c0_61, %c0_62, %c0_63, %c0_64], %81 {strides = array<i32>} : memref<1x8x16x8xf32, #tpu.memory_space<vmem>>, vector<1x8x16x8xf32>,
    return
  }
  func.func @transform_0(%arg0: i32, %arg1: i32) -> (i32, i32, i32, i32) {
    %c0_i32 = arith.constant 0 : i32
    %c0_i32_0 = arith.constant 0 : i32
    %c0_i32_1 = arith.constant 0 : i32
    %c0_i32_2 = arith.constant 0 : i32
    return %arg0, %c0_i32, %c0_i32_0, %c0_i32_1 : i32, i32, i32, i32
  }
  func.func @transform_1(%arg0: i32, %arg1: i32) -> (i32, i32) {
    %c0_i32 = arith.constant 0 : i32
    %c0_i32_0 = arith.constant 0 : i32
    %c0_i32_1 = arith.constant 0 : i32
    return %c0_i32, %c0_i32_0 : i32, i32
  }
  func.func @transform_2(%arg0: i32, %arg1: i32) -> (i32, i32) {
    %c0_i32 = arith.constant 0 : i32
    %c0_i32_0 = arith.constant 0 : i32
    %c0_i32_1 = arith.constant 0 : i32
    return %c0_i32, %c0_i32_0 : i32, i32
  }
  func.func @transform_3(%arg0: i32, %arg1: i32) -> (i32, i32) {
    %c0_i32 = arith.constant 0 : i32
    %c0_i32_0 = arith.constant 0 : i32
    %c0_i32_1 = arith.constant 0 : i32
    return %c0_i32, %c0_i32_0 : i32, i32
  }
  func.func @transform_4(%arg0: i32, %arg1: i32) -> (i32, i32) {
    %c0_i32 = arith.constant 0 : i32
    %c0_i32_0 = arith.constant 0 : i32
    %c0_i32_1 = arith.constant 0 : i32
    return %c0_i32, %c0_i32_0 : i32, i32
  }
  func.func @transform_5(%arg0: i32, %arg1: i32) -> (i32, i32) {
    %c0_i32 = arith.constant 0 : i32
    %c0_i32_0 = arith.constant 0 : i32
    %c0_i32_1 = arith.constant 0 : i32
    return %c0_i32, %c0_i32_0 : i32, i32
  }
  func.func @transform_6(%arg0: i32, %arg1: i32) -> (i32, i32) {
    %c0_i32 = arith.constant 0 : i32
    %c0_i32_0 = arith.constant 0 : i32
    %c0_i32_1 = arith.constant 0 : i32
    return %c0_i32, %c0_i32_0 : i32, i32
  }
  func.func @transform_7(%arg0: i32, %arg1: i32) -> (i32, i32) {
    %c0_i32 = arith.constant 0 : i32
    %c0_i32_0 = arith.constant 0 : i32
    %c0_i32_1 = arith.constant 0 : i32
    return %c0_i32, %c0_i32_0 : i32, i32
  }
  func.func @transform_8(%arg0: i32, %arg1: i32) -> (i32, i32) {
    %c0_i32 = arith.constant 0 : i32
    %c0_i32_0 = arith.constant 0 : i32
    %c0_i32_1 = arith.constant 0 : i32
    return %c0_i32, %c0_i32_0 : i32, i32
  }
  func.func @transform_9(%arg0: i32, %arg1: i32) -> (i32, i32, i32, i32) {
    %c0_i32 = arith.constant 0 : i32
    %c0_i32_0 = arith.constant 0 : i32
    %c0_i32_1 = arith.constant 0 : i32
    return %arg0, %arg1, %c0_i32, %c0_i32_0 : i32, i32, i32, i32
  }
}

</mosaic_0001>

<bundles_post_ra>
// kernel: tpu_custom_call.1
= control target key start
LH: loop header
LB: loop body
LE: loop exit
PB: predicated region body
PF: predicated region fallthrough
CT: control target
= control target key end

     0   :  { %s3497_s30 = smov 0   ;;  %s3499_s10 = smov 0   ;;  %s4896_s0 = inlined_call_operand.vmem [shape: f32[2,18,16,4], index: 0, kind: input, shape index: {}]   ;;  %s4897_s1 = inlined_call_operand.vmem [shape: f32[1,4], index: 1, kind: input, shape index: {}]   ;;  %s4898_s2 = inlined_call_operand.vmem [shape: f32[1,4], index: 2, kind: input, shape index: {}]   ;;  %s4899_s3 = inlined_call_operand.vmem [shape: bf16[4,8], index: 3, kind: input, shape index: {}]   ;;  %s4900_s4 = inlined_call_operand.vmem [shape: f32[1,8], index: 4, kind: input, shape index: {}]   ;;  %s4901_s5 = inlined_call_operand.vmem [shape: bf16[72,8], index: 5, kind: input, shape index: {}]   ;;  %s4902_s6 = inlined_call_operand.vmem [shape: f32[1,8], index: 6, kind: input, shape index: {}]   ;;  %s4903_s7 = inlined_call_operand.vmem [shape: bf16[4,8], index: 7, kind: input, shape index: {}]   ;;  %s4904_s8 = inlined_call_operand.vmem [shape: f32[1,8], index: 8, kind: input, shape index: {}]   ;;  %s4905_s9 = inlined_call_operand.vmem [shape: f32[2,16,16,8], index: 9, kind: output, shape index: {}]  }
   0x1   :  { %s3501_s11 = smov 0   ;;  %s3503_s12 = smov 0  }
   0x2   :  { %s3505_s13 = smov 0  }
   0x3 LB: > { %s28_s14 = sadd.s32 1, %s3429_s11  ;;  %s31_s15 = sadd.s32 1, %s3433_s12  ;;  %s3437_s13 = sphi %s3505_s13, %s19_s13   ;;  %s3433_s12 = sphi %s3503_s12, %s4953_s12   ;;  %s3429_s11 = sphi %s3501_s11, %s4952_s11   ;;  %s3425_s10 = sphi %s3499_s10, %s4951_s10   ;;  %s3421_s30 = sphi %s3497_s30, %s4950_s30  }
   0x4   : > { %p29_p0 = scmp.ge.s32.totalorder %s28_s14, 2  ;;  %p3006_p1 = scmp.ge.s32.totalorder %s3437_s13, 1 }
   0x5   : > { %p301_p2 = scmp.lt.s32.totalorder %s3437_s13, 5 }
   0x6   : > { %s4955_s14 = smov (%p29_p0, %s28_s14), 0  ;;  %s4957_s15 = smov (!%p29_p0, %s31_s15), %s3433_s12 }
   0x7   : > { %p302_p3 = pnand %p3006_p1, %p301_p2  ;;  %p33_p4 = scmp.ge.s32.totalorder %s4957_s15, 2 }
   0x8   : > { %p342_p5 = scmp.lt.s32.totalorder (!%p302_p3), %s3425_s10, 1  ;;  %s3186_s19 = sshll.u32 (!%p302_p3), %s3421_s30, 7 }
   0x9   : > { %s4959_s15 = smov (%p33_p4, %s4957_s15), 0  ;;  %305 = sbr.rel (%p302_p3) target bundleno = 756 (0x2f4), region = 56 }
   0xa   : > { %s3675_s28 = sshll.u32 (!%p302_p3), %s3421_s30, 3  ;;  %s3439_s30 = smov (!%p302_p3), 48  }
   0xb   : > { %s3440_s17 = smov (!%p302_p3), 24   ;;  %s3443_s20 = smov (!%p302_p3), 64  }
   0xc   : > { %s3444_s21 = smov (!%p302_p3), 56   ;;  %s3446_s23 = smov (!%p302_p3), 32  }
   0xd   : > { %p350_p6 = scmp.lt.s32.totalorder (!%p302_p3), %s3675_s28, 15 }
   0xe   : > { %v466_v0 = vld [vmem:[%s4899_s3] sm:$0x3]  ;;  %vm505_vm0 = vcmask 1041408   ;;  %s4961_s10 = smov (!%p342_p5, %s3425_s10), 1  ;;  %vm4906_vm1 = vcmask 31744   ;;  %vm722_vm2 = vcmask 57344  }
   0xf   : > { %3309 = vmatprep.subr.msk.bf16.mxu0 %vm505_vm0, %v466_v0  ;;  %3310 = vmatprep.subr.msk.bf16.mxu1 %vm505_vm0, %v466_v0  ;;  %v507_v1 = vsel %vm505_vm0, %v466_v0, 0  ;;  %s3313_s18 = smul.u32 288, %s4961_s10  ;;  %v3545_v2 = vld [vmem:[%s4897_s1] ss:$0 sm:$0xff]  ;;  %vm723_vm3 = vsmask.f32 256 }
  0x10   : > { %3242 = vmatpush3.bf16.msra.mxu0 %v507_v1  ;;  %3308 = vmatpush3.bf16.msra.mxu1 %v507_v1  ;;  %v3552_v3 = vld [vmem:[%s4898_s2] ss:$0 sm:$0xff]  ;;  %vm755_vm4 = vsmask.f32 7938  ;;  %vm3625_vm5 = vmand %vm722_vm2, %vm723_vm3 }
  0x11   : > { %s346_s22 = scalar_lea.vmem %s4896_s0, %s3313_s18  ;;  %vm3634_vm6 = vmand %vm722_vm2, %vm755_vm4  ;;  %vm1049_vm2 = vcmask 60416   ;;  %s3441_s18 = smov 16  }
  0x12   : > { %s3547_s25 = scalar_lea.vmem %s346_s22, %s3186_s19  ;;  %s3442_s19 = smov 40  }
  0x13   : > { %v362_v4 = vld [vmem:[%s3547_s25] sm:$0xff]  ;;  %v363_v5 = vld [vmem:[%s3547_s25 + $0x8] sm:$0xff]  ;;  %v364_v11 = vld [vmem:[%s3547_s25 + $0x10] sm:$0xff]  ;;  %s3445_s22 = smov 8  }
  0x14   : > { %v374_v6 = vld [vmem:[%s3547_s25 + $0x60] sm:$0xff]  ;;  %v389_v7 = vmul.f32 %v3545_v2, %v362_v4  ;;  %v390_v8 = vmul.f32 %v3545_v2, %v363_v5  ;;  %v375_v9 = vld [vmem:[%s3547_s25 + $0x68] sm:$0xff]  ;;  %v365_v12 = vld [vmem:[%s3547_s25 + $0x18] sm:$0xff]  ;;  %v391_v14 = vmul.f32 %v3545_v2, %v364_v11 }
  0x15   : > { %v401_v10 = vmul.f32 %v3545_v2, %v374_v6  ;;  %v402_v13 = vmul.f32 %v3545_v2, %v375_v9  ;;  %v392_v15 = vmul.f32 %v3545_v2, %v365_v12  ;;  %v376_v16 = vld [vmem:[%s3547_s25 + $0x70] sm:$0xff]  ;;  %v377_v17 = vld [vmem:[%s3547_s25 + $0x78] sm:$0xff]  ;;  %v366_v26 = vld [vmem:[%s3547_s25 + $0x20] sm:$0xff] }
  0x16   : > { %v416_v18 = vadd.f32 %v3552_v3, %v389_v7  ;;  %v417_v19 = vadd.f32 %v3552_v3, %v390_v8  ;;  %v403_v21 = vmul.f32 %v3545_v2, %v376_v16  ;;  %v418_v23 = vadd.f32 %v3552_v3, %v391_v14  ;;  %v367_v27 = vld [vmem:[%s3547_s25 + $0x28] sm:$0xff]  ;;  %v368_v32 = vld [vmem:[%s3547_s25 + $0x30] sm:$0xff]  ;;  %v369_v37 = vld [vmem:[%s3547_s25 + $0x38] sm:$0xff] }
  0x17   : > { %v428_v20 = vadd.f32 %v3552_v3, %v401_v10  ;;  %v429_v22 = vadd.f32 %v3552_v3, %v402_v13  ;;  %v419_v24 = vadd.f32 %v3552_v3, %v392_v15  ;;  %v404_v25 = vmul.f32 %v3545_v2, %v377_v17  ;;  %v378_v38 = vld [vmem:[%s3547_s25 + $0x80] sm:$0xff]  ;;  %v379_v43 = vld [vmem:[%s3547_s25 + $0x88] sm:$0xff]  ;;  %v380_v52 = vld [vmem:[%s3547_s25 + $0x90] sm:$0xff] }
  0x18   : > { %v436_v28 = vmax.f32 %v416_v18, 0.0  ;;  %v437_v29 = vmax.f32 %v417_v19, 0.0  ;;  %v430_v31 = vadd.f32 %v3552_v3, %v403_v21  ;;  %v438_v34 = vmax.f32 %v418_v23, 0.0  ;;  %v381_v53 = vld [vmem:[%s3547_s25 + $0x98] sm:$0xff]  ;;  %v370_v57 = vld [vmem:[%s3547_s25 + $0x40] sm:$0xff]  ;;  %v371_v62 = vld [vmem:[%s3547_s25 + $0x48] sm:$0xff] }
  0x19   : > { %v448_v30 = vmax.f32 %v428_v20, 0.0  ;;  %v449_v33 = vmax.f32 %v429_v22, 0.0  ;;  %v439_v35 = vmax.f32 %v419_v24, 0.0  ;;  %v431_v36 = vadd.f32 %v3552_v3, %v404_v25  ;;  %v372_v5 = vld [vmem:[%s3547_s25 + $0x50] sm:$0xff]  ;;  %v373_v6 = vld [vmem:[%s3547_s25 + $0x58] sm:$0xff] }
  0x1a   : > { %v456_v39 = vpack.c.bf16 %v437_v29, %v436_v28  ;;  %v450_v40 = vmax.f32 %v430_v31, 0.0  ;;  %v393_v41 = vmul.f32 %v3545_v2, %v366_v26  ;;  %v394_v42 = vmul.f32 %v3545_v2, %v367_v27  ;;  %v728_v31 = vld [vmem:[#allocation2 + $0xc] sm:$0x1] }
  0x1b   : > { %v462_v44 = vpack.c.bf16 %v449_v33, %v448_v30  ;;  %v457_v45 = vpack.c.bf16 %v439_v35, %v438_v34  ;;  %v451_v46 = vmax.f32 %v431_v36, 0.0  ;;  %v395_v47 = vmul.f32 %v3545_v2, %v368_v32  ;;  %v746_v32 = vld [vmem:[#allocation2 + $0x54] sm:$0x1]  ;;  %v725_v35 = vld [vmem:[#allocation2] sm:$0x1] }
  0x1c   : > { %3243 = vmatprep.mubr.msk.bf16.mxu0 %vm4906_vm1, %v456_v39  ;;  %v420_v48 = vadd.f32 %v3552_v3, %v393_v41  ;;  %v421_v49 = vadd.f32 %v3552_v3, %v394_v42  ;;  %v396_v50 = vmul.f32 %v3545_v2, %v369_v37  ;;  %v405_v51 = vmul.f32 %v3545_v2, %v378_v38  ;;  %v743_v36 = vld [vmem:[#allocation2 + $0x48] sm:$0x1]  ;;  %v778_v41 = vld [vmem:[#allocation2 + $0x5c] sm:$0x1] }
  0x1d   : > { %3255 = vmatprep.mubr.msk.bf16.mxu1 %vm4906_vm1, %v462_v44  ;;  %3244 = vmatmul.mubr.msk.bf16.vlgmr.msra.gmra.mxu0 %vm4906_vm1, %v457_v45  ;;  %v463_v54 = vpack.c.bf16 %v451_v46, %v450_v40  ;;  %v422_v55 = vadd.f32 %v3552_v3, %v395_v47  ;;  %v406_v56 = vmul.f32 %v3545_v2, %v379_v43  ;;  %v729_v33 = vsel %vm3625_vm5, 0, %v728_v31  ;;  %v760_v40 = vld [vmem:[#allocation2 + $0x14] sm:$0x1]  ;;  %v757_v44 = vld [vmem:[#allocation2 + $0x8] sm:$0x1] }
  0x1e   : > { %v440_v58 = vmax.f32 %v420_v48, 0.0  ;;  %v441_v59 = vmax.f32 %v421_v49, 0.0  ;;  %v423_v60 = vadd.f32 %v3552_v3, %v396_v50  ;;  %v432_v61 = vadd.f32 %v3552_v3, %v405_v51  ;;  %730 = vst [vmem:[#allocation2 + $0xc] sm:$0x1] %v729_v33  ;;  %v775_v46 = vld [vmem:[#allocation2 + $0x50] sm:$0x1] }
  0x1f   : > { %3256 = vmatmul.mubr.msk.bf16.vlgmr.msra.gmra.mxu1 %vm4906_vm1, %v463_v54  ;;  %v442_v63 = vmax.f32 %v422_v55, 0.0  ;;  %v433_v0 = vadd.f32 %v3552_v3, %v406_v56  ;;  %v407_v1 = vmul.f32 %v3545_v2, %v380_v52  ;;  %v408_v4 = vmul.f32 %v3545_v2, %v381_v53  ;;  %v734_v48 = vld [vmem:[#allocation2 + $0x24] sm:$0x1]  ;;  %v731_v50 = vld [vmem:[#allocation2 + $0x18] sm:$0x1] }
  0x20   : > { %v458_v7 = vpack.c.bf16 %v441_v59, %v440_v58  ;;  %v443_v8 = vmax.f32 %v423_v60, 0.0  ;;  %v452_v9 = vmax.f32 %v432_v61, 0.0  ;;  %v397_v10 = vmul.f32 %v3545_v2, %v370_v57  ;;  %v766_v52 = vld [vmem:[#allocation2 + $0x2c] sm:$0x1]  ;;  %v763_v54 = vld [vmem:[#allocation2 + $0x20] sm:$0x1] }
  0x21   : > { %v453_v11 = vmax.f32 %v433_v0, 0.0  ;;  %v434_v12 = vadd.f32 %v3552_v3, %v407_v1  ;;  %v435_v13 = vadd.f32 %v3552_v3, %v408_v4  ;;  %v398_v14 = vmul.f32 %v3545_v2, %v371_v62  ;;  %v752_v56 = vld [vmem:[#allocation2 + $0x6c] sm:$0x1]  ;;  %v749_v58 = vld [vmem:[#allocation2 + $0x60] sm:$0x1] }
  0x22   : > { %3247 = vmatprep.mubr.msk.bf16.mxu0 %vm4906_vm1, %v458_v7  ;;  %v459_v15 = vpack.c.bf16 %v443_v8, %v442_v63  ;;  %v424_v16 = vadd.f32 %v3552_v3, %v397_v10  ;;  %v399_v17 = vmul.f32 %v3545_v2, %v372_v5  ;;  %v400_v18 = vmul.f32 %v3545_v2, %v373_v6  ;;  %v784_v60 = vld [vmem:[#allocation2 + $0x74] sm:$0x1]  ;;  %v781_v62 = vld [vmem:[#allocation2 + $0x68] sm:$0x1]  ;;  %v740_v0 = vld [vmem:[#allocation2 + $0x3c] sm:$0x1] }
  0x23   : > { %v464_v19 = vpack.c.bf16 %v453_v11, %v452_v9  ;;  %v454_v20 = vmax.f32 %v434_v12, 0.0  ;;  %v455_v21 = vmax.f32 %v435_v13, 0.0  ;;  %v425_v22 = vadd.f32 %v3552_v3, %v398_v14  ;;  %v737_v4 = vld [vmem:[#allocation2 + $0x30] sm:$0x1]  ;;  %v772_v6 = vld [vmem:[#allocation2 + $0x44] sm:$0x1] }
  0x24   : > { %v444_v23 = vmax.f32 %v424_v16, 0.0  ;;  %v426_v24 = vadd.f32 %v3552_v3, %v399_v17  ;;  %v427_v25 = vadd.f32 %v3552_v3, %v400_v18  ;;  %v747_v34 = vsel %vm3625_vm5, 0, %v746_v32  ;;  %v769_v8 = vld [vmem:[#allocation2 + $0x38] sm:$0x1]  ;;  %v3681_v13 = vld [vmem:[%s4900_s4] ss:$0 sm:$0xff] }
  0x25   : > { %3248 = vmatmul.mubr.msk.bf16.gmra.mxu0 %vm4906_vm1, %v459_v15  ;;  %3259 = vmatprep.mubr.msk.bf16.mxu1 %vm4906_vm1, %v464_v19  ;;  %v465_v26 = vpack.c.bf16 %v455_v21, %v454_v20  ;;  %v445_v27 = vmax.f32 %v425_v22, 0.0  ;;  %748 = vst [vmem:[#allocation2 + $0x54] sm:$0x1] %v747_v34  ;;  %v726_v38 = vsel %vm3625_vm5, 0, %v725_v35  ;;  %v744_v39 = vsel %vm3625_vm5, 0, %v743_v36 }
  0x26   : > { %v446_v28 = vmax.f32 %v426_v24, 0.0  ;;  %v447_v29 = vmax.f32 %v427_v25, 0.0  ;;  %727 = vst [vmem:[#allocation2] sm:$0x1] %v726_v38  ;;  %745 = vst [vmem:[#allocation2 + $0x48] sm:$0x1] %v744_v39  ;;  %v642_v10 = vstv %s3675_s28 }
  0x27   : > { %3260 = vmatmul.mubr.msk.bf16.gmra.mxu1 %vm4906_vm1, %v465_v26  ;;  %v460_v2 = vpack.c.bf16 %v445_v27, %v444_v23  ;;  %v761_v42 = vsel %vm3634_vm6, 0, %v760_v40  ;;  %v779_v43 = vsel %vm3634_vm6, 0, %v778_v41  ;;  %v758_v45 = vsel %vm3634_vm6, 0, %v757_v44  ;;  %s4963_s28 = smov (!%p350_p6, %s3675_s28), 15 }
  0x28   : > { %v461_v30 = vpack.c.bf16 %v447_v29, %v446_v28  ;;  %762 = vst [vmem:[#allocation2 + $0x14] sm:$0x1] %v761_v42  ;;  %780 = vst [vmem:[#allocation2 + $0x5c] sm:$0x1] %v779_v43  ;;  %v776_v47 = vsel %vm3634_vm6, 0, %v775_v46  ;;  %v735_v49 = vsel %vm3625_vm5, 0, %v734_v48 }
  0x29   : > { %3251 = vmatprep.mubr.msk.bf16.mxu0 %vm4906_vm1, %v460_v2  ;;  %759 = vst [vmem:[#allocation2 + $0x8] sm:$0x1] %v758_v45  ;;  %777 = vst [vmem:[#allocation2 + $0x50] sm:$0x1] %v776_v47  ;;  %v732_v51 = vsel %vm3625_vm5, 0, %v731_v50  ;;  %v767_v53 = vsel %vm3634_vm6, 0, %v766_v52 }
  0x2a   : > { %736 = vst [vmem:[#allocation2 + $0x24] sm:$0x1] %v735_v49  ;;  %733 = vst [vmem:[#allocation2 + $0x18] sm:$0x1] %v732_v51  ;;  %v764_v55 = vsel %vm3634_vm6, 0, %v763_v54  ;;  %v753_v57 = vsel %vm3625_vm5, 0, %v752_v56 }
  0x2b   : > { %768 = vst [vmem:[#allocation2 + $0x2c] sm:$0x1] %v767_v53  ;;  %765 = vst [vmem:[#allocation2 + $0x20] sm:$0x1] %v764_v55  ;;  %v750_v59 = vsel %vm3625_vm5, 0, %v749_v58  ;;  %v785_v61 = vsel %vm3634_vm6, 0, %v784_v60 }
  0x2c   : > { %754 = vst [vmem:[#allocation2 + $0x6c] sm:$0x1] %v753_v57  ;;  %751 = vst [vmem:[#allocation2 + $0x60] sm:$0x1] %v750_v59  ;;  %v782_v63 = vsel %vm3634_vm6, 0, %v781_v62  ;;  %v741_v1 = vsel %vm3625_vm5, 0, %v740_v0 }
  0x2d   : > { %3252 = vmatmul.mubr.msk.bf16.gmra.mxu0 %vm4906_vm1, %v461_v30  ;;  %786 = vst [vmem:[#allocation2 + $0x74] sm:$0x1] %v785_v61  ;;  %783 = vst [vmem:[#allocation2 + $0x68] sm:$0x1] %v782_v63  ;;  %v738_v5 = vsel %vm3625_vm5, 0, %v737_v4  ;;  %v773_v7 = vsel %vm3634_vm6, 0, %v772_v6 }
  0x2e   : > { %742 = vst [vmem:[#allocation2 + $0x3c] sm:$0x1] %v741_v1  ;;  %739 = vst [vmem:[#allocation2 + $0x30] sm:$0x1] %v738_v5  ;;  %v770_v9 = vsel %vm3634_vm6, 0, %v769_v8  ;;  %v643_v11 = vadd.s32 1, %v642_v10 }
  0x2f   : > { %774 = vst [vmem:[#allocation2 + $0x44] sm:$0x1] %v773_v7  ;;  %771 = vst [vmem:[#allocation2 + $0x38] sm:$0x1] %v770_v9  ;;  %v649_v12 = vadd.s32 7, %v642_v10  ;;  %v648_v14 = vadd.s32 6, %v642_v10 }
  0x30   : > { %vm653_vm7 = vcmp.ge.s32.totalorder %v643_v11, 1  ;;  %vm663_vm8 = vcmp.le.s32.totalorder %v643_v11, 16  ;;  %vm652_vm11 = vcmp.ge.s32.totalorder %v642_v10, 1  ;;  %vm662_vm12 = vcmp.le.s32.totalorder %v642_v10, 16  ;;  %v1059_v59 = vld [vmem:[#allocation2 + $0xc] sm:$0xf] }
  0x31   : > { %vm659_vm9 = vcmp.ge.s32.totalorder %v649_v12, 1  ;;  %vm669_vm10 = vcmp.le.s32.totalorder %v649_v12, 16  ;;  %vm3684_vm13 = vmand %vm653_vm7, %vm663_vm8  ;;  %vm658_vm14 = vcmp.ge.s32.totalorder %v648_v14, 1  ;;  %vm668_vm15 = vcmp.le.s32.totalorder %v648_v14, 16  ;;  %v1101_v6 = vld [vmem:[#allocation2 + $0x54] sm:$0xf] }
  0x32   : > { %vm3689_vm6 = vmand %vm659_vm9, %vm669_vm10  ;;  %v3698_v27 = vadd.s32 3, %v642_v10  ;;  %v3700_v28 = vadd.s32 2, %v642_v10  ;;  %v3702_v29 = vadd.s32 9, %v642_v10  ;;  %v3704_v2 = vadd.s32 8, %v642_v10  ;;  %v1051_v7 = vld [vmem:[#allocation2] sm:$0xf] }
  0x33   : > { %vm3694_vm1 = vmand %vm652_vm11, %vm662_vm12  ;;  %v3716_v39 = vadd.s32 5, %v642_v10  ;;  %v3718_v40 = vadd.s32 4, %v642_v10  ;;  %vm847_vm8 = vsmask.f32 4368 }
  0x34   : > { %vm3711_vm7 = vmand %vm658_vm14, %vm668_vm15  ;;  %vm655_vm9 = vcmp.ge.s32.totalorder %v3698_v27, 1  ;;  %vm665_vm10 = vcmp.le.s32.totalorder %v3698_v27, 16  ;;  %vm654_vm11 = vcmp.ge.s32.totalorder %v3700_v28, 1  ;;  %vm664_vm12 = vcmp.le.s32.totalorder %v3700_v28, 16 }
  0x35   : > { %vm3736_vm14 = vmand %vm1049_vm2, %vm755_vm4  ;;  %vm671_vm15 = vcmp.le.s32.totalorder %v3702_v29, 16 }
  0x36   : > { %vm3762_vm4 = vmor %vm723_vm3, %vm847_vm8 }
  0x37   : > { %vm3777_vm3 = vmand %vm655_vm9, %vm665_vm10  ;;  %vm1373_vm10 = vcmask 1042432  }
  0xdd   : > { %v3245_v15 = vpop.f32.mrf.mxu0 }
  0xde   : > { %v552_v16 = vadd.f32 %v3245_v15, %v3681_v13 }
  0xdf   : > { %v3257_v18 = vpop.f32.mrf.mxu1  ;;  %v543_v19 = vpop.f32.mrf.mxu0 }
  0xe0   : > { %v624_v20 = vmax.f32 %v552_v16, 0.0  ;;  %v600_v21 = vadd.f32 %v3257_v18, %v3681_v13  ;;  %v544_v23 = vadd.f32 %v3681_v13, %v543_v19 }
  0xe1   : > { %v591_v25 = vpop.f32.mrf.mxu1  ;;  %v3246_v26 = vpop.f32.mrf.mxu0 }
  0xe2   : > { %v704_v30 = vsel %vm3684_vm13, %v624_v20, 0.0  ;;  %v636_v31 = vmax.f32 %v600_v21, 0.0  ;;  %v622_v32 = vmax.f32 %v544_v23, 0.0  ;;  %v592_v33 = vadd.f32 %v3681_v13, %v591_v25 }
  0xe3   : > { %v3189_v34 = vpack.c.bf16 %v704_v30, %v704_v30  ;;  %v555_v36 = vadd.f32 %v3246_v26, %v3681_v13  ;;  %v3258_v37 = vpop.f32.mrf.mxu1  ;;  %v546_v38 = vpop.f32.mrf.mxu0  ;;  %v1094_v26 = vld [vmem:[#allocation2 + $0x48] sm:$0xf] }
  0xe4   : > { %v716_v41 = vsel %vm3689_vm6, %v636_v31, 0.0  ;;  %v702_v42 = vsel %vm3694_vm1, %v622_v32, 0.0  ;;  %v634_v43 = vmax.f32 %v592_v33, 0.0  ;;  %v603_v44 = vadd.f32 %v3258_v37, %v3681_v13 }
  0xe5   : > { %v867_v45 = vshrl.u32 %v3189_v34, 16  ;;  %v870_v46 = vshll.u32 %v3189_v34, 16  ;;  %v3201_v47 = vpack.c.bf16 %v716_v41, %v716_v41  ;;  %v3187_v48 = vpack.c.bf16 %v702_v42, %v702_v42  ;;  %v3249_v57 = vpop.f32.mrf.mxu0  ;;  %v594_v22 = vpop.f32.mrf.mxu1 }
  0xe6   : > { %v714_v49 = vsel %vm3711_vm7, %v634_v43, 0.0  ;;  %v625_v50 = vmax.f32 %v555_v36, 0.0  ;;  %v637_v51 = vmax.f32 %v603_v44, 0.0  ;;  %v547_v52 = vadd.f32 %v3681_v13, %v546_v38  ;;  %v1063_v38 = vld [vmem:[#allocation2 + $0x14] sm:$0x1] }
  0xe7   : > { %v3732_v53 = vrot.slane %v867_v45, 7  ;;  %v969_v54 = vshrl.u32 %v3201_v47, 16  ;;  %v972_v55 = vshll.u32 %v3201_v47, 16  ;;  %v850_v56 = vshrl.u32 %v3187_v48, 16  ;;  %v559_v17 = vpop.f32.mrf.mxu0 }
  0xe8   : > { %v853_v60 = vshll.u32 %v3187_v48, 16  ;;  %v3199_v61 = vpack.c.bf16 %v714_v49, %v714_v49  ;;  %v705_v62 = vsel %vm3684_vm13, %v625_v50, 0.0  ;;  %v717_v63 = vsel %vm3689_vm6, %v637_v51, 0.0  ;;  %v1105_v49 = vld [vmem:[#allocation2 + $0x5c] sm:$0x1] }
  0xe9   : > { %v872_v0 = vor.u32 %v870_v46, %v3732_v53  ;;  %v873_v1 = vrot.slane %v3732_v53, 4  ;;  %v971_v4 = vrot.slane %v969_v54, 7  ;;  %v3746_v5 = vrot.slane %v850_v56, 7  ;;  %v3250_v45 = vpop.f32.mrf.mxu0 }
  0xea   : > { %v952_v8 = vshrl.u32 %v3199_v61, 16  ;;  %v955_v9 = vshll.u32 %v3199_v61, 16  ;;  %v3190_v10 = vpack.c.bf16 %v705_v62, %v705_v62  ;;  %v3202_v11 = vpack.c.bf16 %v717_v63, %v717_v63 }
  0xeb   : > { %v1060_v12 = vsel %vm3736_vm14, %v872_v0, %v1059_v59  ;;  %v974_v14 = vor.u32 %v972_v55, %v971_v4  ;;  %v975_v15 = vrot.slane %v971_v4, 4  ;;  %v855_v16 = vor.u32 %v853_v60, %v3746_v5  ;;  %v562_v63 = vpop.f32.mrf.mxu0 }
  0xec   : > { %1061 = vst [vmem:[#allocation2 + $0xc] sm:$0xf] %v1060_v12  ;;  %v856_v18 = vrot.slane %v3746_v5, 4  ;;  %v3752_v19 = vrot.slane %v952_v8, 7  ;;  %v875_v20 = vshrl.u32 %v3190_v10, 16  ;;  %v878_v21 = vshll.u32 %v3190_v10, 16 }
  0xed   : > { %v1102_v23 = vsel %vm3736_vm14, %v974_v14, %v1101_v6  ;;  %v1052_v25 = vsel %vm3736_vm14, %v855_v16, %v1051_v7  ;;  %v977_v30 = vshrl.u32 %v3202_v11, 16  ;;  %v980_v31 = vshll.u32 %v3202_v11, 16  ;;  %v3261_v11 = vpop.f32.mrf.mxu1  ;;  %v1056_v14 = vld [vmem:[#allocation2 + $0x8] sm:$0x1] }
  0xee   : > { %1103 = vst [vmem:[#allocation2 + $0x54] sm:$0xf] %v1102_v23  ;;  %1053 = vst [vmem:[#allocation2] sm:$0xf] %v1052_v25  ;;  %v957_v32 = vor.u32 %v955_v9, %v3752_v19  ;;  %v958_v33 = vrot.slane %v3752_v19, 4  ;;  %v877_v34 = vrot.slane %v875_v20, 7  ;;  %v595_v42 = vadd.f32 %v3681_v13, %v594_v22 }
  0xef   : > { %v623_v36 = vmax.f32 %v547_v52, 0.0  ;;  %v979_v41 = vrot.slane %v977_v30, 7  ;;  %v568_v43 = vadd.f32 %v3249_v57, %v3681_v13  ;;  %v560_v44 = vadd.f32 %v3681_v13, %v559_v17 }
  0xf0   : > { %v1095_v46 = vsel %vm3736_vm14, %v957_v32, %v1094_v26  ;;  %v880_v47 = vor.u32 %v878_v21, %v877_v34  ;;  %v882_v48 = vrot.slane %v877_v34, 4  ;;  %vm661_vm13 = vcmp.ge.s32.totalorder %v3702_v29, 1 }
  0xf1   : > { %v703_v50 = vsel %vm3694_vm1, %v623_v36, 0.0  ;;  %1096 = vst [vmem:[#allocation2 + $0x48] sm:$0xf] %v1095_v46  ;;  %v982_v52 = vor.u32 %v980_v31, %v979_v41  ;;  %v984_v53 = vrot.slane %v979_v41, 4  ;;  %v635_v55 = vmax.f32 %v595_v42, 0.0  ;;  %vm3787_vm1 = vmand %vm654_vm11, %vm664_vm12 }
  0xf2   : > { %v3188_v54 = vpack.c.bf16 %v703_v50, %v703_v50  ;;  %v881_v27 = vsel %vm3762_vm4, %v873_v1, %v880_v47  ;;  %v1064_v56 = vsel %vm3625_vm5, %v882_v48, %v1063_v38  ;;  %v628_v57 = vmax.f32 %v568_v43, 0.0  ;;  %v1098_v38 = vld [vmem:[#allocation2 + $0x50] sm:$0x1]  ;;  %v1073_v43 = vld [vmem:[#allocation2 + $0x24] sm:$0xf]  ;;  %vm3830_vm8 = vmand %vm661_vm13, %vm671_vm15 }
  0xf3   : > { %v626_v59 = vmax.f32 %v560_v44, 0.0  ;;  %1062 = vst.msk [vmem:[#allocation2 + $0x10] sm:$0xf] %vm1049_vm2, %v881_v27  ;;  %1065 = vst [vmem:[#allocation2 + $0x14] sm:$0x1] %v1064_v56  ;;  %v983_v60 = vsel %vm3762_vm4, %v975_v15, %v982_v52  ;;  %v1106_v28 = vsel %vm3625_vm5, %v984_v53, %v1105_v49  ;;  %v715_v0 = vsel %vm3711_vm7, %v635_v55, 0.0 }
  0xf4   : > { %v858_v61 = vshrl.u32 %v3188_v54, 16  ;;  %v861_v62 = vshll.u32 %v3188_v54, 16  ;;  %1104 = vst.msk [vmem:[#allocation2 + $0x58] sm:$0xf] %vm1049_vm2, %v983_v60  ;;  %1107 = vst [vmem:[#allocation2 + $0x5c] sm:$0x1] %v1106_v28  ;;  %v571_v6 = vadd.f32 %v3250_v45, %v3681_v13  ;;  %v3200_v8 = vpack.c.bf16 %v715_v0, %v715_v0  ;;  %v607_v28 = vpop.f32.mrf.mxu1 }
  0xf5   : > { %v708_v1 = vsel %vm3777_vm3, %v628_v57, 0.0  ;;  %v706_v4 = vsel %vm3787_vm1, %v626_v59, 0.0  ;;  %v3808_v12 = vld [vmem:[#allocation2 + $0x54] sm:$0xf]  ;;  %v563_v35 = vadd.f32 %v3681_v13, %v562_v63  ;;  %v616_v16 = vadd.f32 %v3261_v11, %v3681_v13 }
  0xf6   : > { %v860_v7 = vrot.slane %v858_v61, 7  ;;  %v3193_v9 = vpack.c.bf16 %v708_v1, %v708_v1  ;;  %v3191_v10 = vpack.c.bf16 %v706_v4, %v706_v4  ;;  %v629_v15 = vmax.f32 %v571_v6, 0.0  ;;  %v1077_v1 = vld [vmem:[#allocation2 + $0x2c] sm:$0x1] }
  0xf7   : > { %v1883_v17 = vshrl.u32 %v3808_v12, 16  ;;  %v960_v22 = vshrl.u32 %v3200_v8, 16  ;;  %v963_v23 = vshll.u32 %v3200_v8, 16  ;;  %vm660_vm6 = vcmp.ge.s32.totalorder %v3704_v2, 1 }
  0xf8   : > { %v863_v20 = vor.u32 %v861_v62, %v860_v7  ;;  %v865_v21 = vrot.slane %v860_v7, 4  ;;  %vm670_vm7 = vcmp.le.s32.totalorder %v3704_v2, 16  ;;  %v901_v25 = vshrl.u32 %v3193_v9, 16 }
  0xf9   : > { %v904_v26 = vshll.u32 %v3193_v9, 16  ;;  %v884_v30 = vshrl.u32 %v3191_v10, 16  ;;  %v887_v31 = vshll.u32 %v3191_v10, 16  ;;  %v962_v36 = vrot.slane %v960_v22, 7  ;;  %vm3866_vm9 = vmand %vm660_vm6, %vm670_vm7 }
  0xfa   : > { %v864_v32 = vsel %vm3762_vm4, %v856_v18, %v863_v20  ;;  %v1057_v34 = vsel %vm3625_vm5, %v865_v21, %v1056_v14  ;;  %v709_v41 = vsel %vm3777_vm3, %v629_v15, 0.0  ;;  %v903_v42 = vrot.slane %v901_v25, 7  ;;  %v1066_v18 = vld [vmem:[#allocation2 + $0x18] sm:$0xf]  ;;  %v1433_v14 = vld [vmem:[#allocation2 + $0xc] sm:$0xf]  ;;  %v3262_v21 = vpop.f32.mrf.mxu1 }
  0xfb   : > { %1055 = vst.msk [vmem:[#allocation2 + $0x4] sm:$0xf] %vm1049_vm2, %v864_v32  ;;  %1058 = vst [vmem:[#allocation2 + $0x8] sm:$0x1] %v1057_v34  ;;  %v3824_v44 = vrot.slane %v884_v30, 7  ;;  %v3194_v45 = vpack.c.bf16 %v709_v41, %v709_v41  ;;  %v627_v5 = vmax.f32 %v563_v35, 0.0  ;;  %v965_v46 = vor.u32 %v963_v23, %v962_v36 }
  0xfc   : > { %v967_v47 = vrot.slane %v962_v36, 4  ;;  %v640_v48 = vmax.f32 %v616_v16, 0.0  ;;  %v1885_v50 = vrot.slane %v1883_v17, 4  ;;  %v906_v51 = vor.u32 %v904_v26, %v903_v42  ;;  %v3842_v57 = vld [vmem:[#allocation2 + $0x58] sm:$0xf] }
  0xfd   : > { %v907_v52 = vrot.slane %v903_v42, 4  ;;  %v889_v53 = vor.u32 %v887_v31, %v3824_v44  ;;  %v890_v54 = vrot.slane %v3824_v44, 4  ;;  %v966_v55 = vsel %vm3762_vm4, %v958_v33, %v965_v46  ;;  %v3870_v20 = vld [vmem:[#allocation2 + $0x10] sm:$0xf]  ;;  %v1070_v30 = vld [vmem:[#allocation2 + $0x20] sm:$0x1] }
  0xfe   : > { %v1099_v27 = vsel %vm3625_vm5, %v967_v47, %v1098_v38  ;;  %v909_v29 = vshrl.u32 %v3194_v45, 16  ;;  %v912_v56 = vshll.u32 %v3194_v45, 16  ;;  %1097 = vst.msk [vmem:[#allocation2 + $0x4c] sm:$0xf] %vm1049_vm2, %v966_v55  ;;  %v1074_v59 = vsel %vm3736_vm14, %v906_v51, %v1073_v43  ;;  %v1115_v41 = vld [vmem:[#allocation2 + $0x6c] sm:$0xf]  ;;  %v610_v47 = vpop.f32.mrf.mxu1 }
  0xff   : > { %1100 = vst [vmem:[#allocation2 + $0x50] sm:$0x1] %v1099_v27  ;;  %v1067_v60 = vsel %vm3736_vm14, %v889_v53, %v1066_v18  ;;  %v707_v19 = vsel %vm3787_vm1, %v627_v5, 0.0  ;;  %v720_v33 = vsel %vm3830_vm8, %v640_v48, 0.0  ;;  %1075 = vst [vmem:[#allocation2 + $0x24] sm:$0xf] %v1074_v59  ;;  %v3124_v4 = vcombine.low %v3808_v12, %v3842_v57 }
 0x100   : > { %1068 = vst [vmem:[#allocation2 + $0x18] sm:$0xf] %v1067_v60  ;;  %v911_v61 = vrot.slane %v909_v29, 7  ;;  %v3192_v62 = vpack.c.bf16 %v707_v19, %v707_v19  ;;  %v3205_v63 = vpack.c.bf16 %v720_v33, %v720_v33  ;;  %v1886_v0 = vshll.u32 %v3808_v12, 16 }
 0x101   : > { %v1892_v6 = vshll.u32 %v3842_v57, 16  ;;  %v1896_v24 = vshrl.u32 %v3842_v57, 16  ;;  %v608_v7 = vadd.f32 %v3681_v13, %v607_v28  ;;  %2324 = vrot.lane.b32.xlu1 %v3124_v4, %s3439_s30  ;;  %v1458_v32 = vshrl.u32 %v1433_v14, 16 }
 0x102   : > { %v914_v8 = vor.u32 %v912_v56, %v911_v61  ;;  %v916_v9 = vrot.slane %v911_v61, 4  ;;  %v892_v10 = vshrl.u32 %v3192_v62, 16  ;;  %v895_v11 = vshll.u32 %v3192_v62, 16 }
 0x103   : > { %v1003_v15 = vshrl.u32 %v3205_v63, 16  ;;  %v1006_v35 = vshll.u32 %v3205_v63, 16  ;;  %v1888_v16 = vrot.slane %v1886_v0, 5  ;;  %v3860_v17 = vrot.slane %v1896_v24, 4  ;;  %v1445_v63 = vld [vmem:[#allocation2 + $0x54] sm:$0xf] }
 0x104   : > { %v915_v22 = vsel %vm3762_vm4, %v907_v52, %v914_v8  ;;  %v1078_v23 = vsel %vm3625_vm5, %v916_v9, %v1077_v1  ;;  %v894_v25 = vrot.slane %v892_v10, 7  ;;  %v638_v26 = vmax.f32 %v608_v7, 0.0  ;;  %v1443_v52 = vld [vmem:[#allocation2 + $0x48] sm:$0xf]  ;;  %v1108_v0 = vld [vmem:[#allocation2 + $0x60] sm:$0xf] }
 0x105   : > { %1076 = vst.msk [vmem:[#allocation2 + $0x28] sm:$0xf] %vm1049_vm2, %v915_v22  ;;  %1079 = vst [vmem:[#allocation2 + $0x2c] sm:$0x1] %v1078_v23  ;;  %v3877_v2 = vrot.slane %v1003_v15, 7  ;;  %v1889_v31 = vor.u32 %v1888_v16, %v1885_v50  ;;  %v1461_v34 = vshll.u32 %v1433_v14, 16  ;;  %v3095_v43 = vcombine.low %v1433_v14, %v3870_v20 }
 0x106   : > { %v897_v36 = vor.u32 %v895_v11, %v894_v25  ;;  %v899_v38 = vrot.slane %v894_v25, 4  ;;  %v718_v42 = vsel %vm3866_vm9, %v638_v26, 0.0  ;;  %v1460_v50 = vrot.slane %v1458_v32, 4  ;;  %v3891_v53 = vld [vmem:[#allocation2 + $0x4c] sm:$0xf] }
 0x107   : > { %v1008_v44 = vor.u32 %v1006_v35, %v3877_v2  ;;  %v1009_v45 = vrot.slane %v3877_v2, 4  ;;  %v3884_v5 = vrot.slane %v1889_v31, 4  ;;  %v3203_v46 = vpack.c.bf16 %v718_v42, %v718_v42  ;;  %2186 = vrot.lane.b32.xlu0 %v3095_v43, %s3440_s17  ;;  %v3913_v14 = vld [vmem:[#allocation2 + $0x58] sm:$0xf]  ;;  %v1342_v22 = vld [vmem:[#allocation2 + $0xc] sm:$0xe] }
 0x108   : > { %v898_v18 = vsel %vm3762_vm4, %v890_v54, %v897_v36  ;;  %v1071_v48 = vsel %vm3625_vm5, %v899_v38, %v1070_v30  ;;  %v1463_v51 = vrot.slane %v1461_v34, 5  ;;  %vm1374_vm11 = vcmask 1046532   ;;  %v1746_v31 = vld [vmem:[#allocation2 + $0x48] sm:$0xf]  ;;  %v3923_v32 = vld [vmem:[#allocation2 + $0x4c] sm:$0xf] }
 0x109   : > { %1069 = vst.msk [vmem:[#allocation2 + $0x1c] sm:$0xf] %vm1049_vm2, %v898_v18  ;;  %1072 = vst [vmem:[#allocation2 + $0x20] sm:$0x1] %v1071_v48  ;;  %v1116_v55 = vsel %vm3736_vm14, %v1008_v44, %v1115_v41  ;;  %v986_v54 = vshrl.u32 %v3203_v46, 16  ;;  %v989_v27 = vshll.u32 %v3203_v46, 16  ;;  %v619_v60 = vadd.f32 %v3262_v21, %v3681_v13 }
 0x10a   : > { %v1467_v29 = vshll.u32 %v3870_v20, 16  ;;  %1117 = vst [vmem:[#allocation2 + $0x6c] sm:$0xf] %v1116_v55  ;;  %v1464_v56 = vor.u32 %v1463_v51, %v1460_v50  ;;  %v1471_v59 = vshrl.u32 %v3870_v20, 16  ;;  %v611_v19 = vadd.f32 %v3681_v13, %v610_v47  ;;  %v1649_v34 = vld [vmem:[#allocation2 + $0xc] sm:$0xe]  ;;  %vm3940_vm12 = vmor %vm1373_vm10, %vm1374_vm11 }
 0x10b   : > { %v3900_v33 = vrot.slane %v986_v54, 7  ;;  %v1591_v28 = vshrl.u32 %v3891_v53, 16  ;;  %v3100_v61 = vcombine.low %v1443_v52, %v3891_v53  ;;  %v1578_v62 = vshrl.u32 %v1443_v52, 16  ;;  %v3931_v41 = vld [vmem:[#allocation2 + $0x10] sm:$0xf] }
 0x10c   : > { %v3904_v1 = vrot.slane %v1464_v56, 4  ;;  %v3906_v4 = vrot.slane %v1471_v59, 4  ;;  %v641_v24 = vmax.f32 %v619_v60, 0.0  ;;  %v639_v7 = vmax.f32 %v611_v19, 0.0  ;;  %v3933_v47 = vld [vmem:[#allocation2 + $0x14] sm:$0x1] }
 0x10d   : > { %v991_v8 = vor.u32 %v989_v27, %v3900_v33  ;;  %v992_v9 = vrot.slane %v3900_v33, 4  ;;  %2196 = vrot.lane.b32.xlu1 %v3100_v61, %s3440_s17  ;;  %v3911_v10 = vrot.slane %v1578_v62, 4  ;;  %v1581_v11 = vshll.u32 %v1443_v52, 16  ;;  %v1119_v18 = vld [vmem:[#allocation2 + $0x74] sm:$0x1] }
 0x10e   : > { %v721_v15 = vsel %vm3830_vm8, %v641_v24, 0.0  ;;  %v719_v35 = vsel %vm3866_vm9, %v639_v7, 0.0  ;;  %v1602_v16 = vshrl.u32 %v1445_v63, 16  ;;  %v1605_v21 = vshll.u32 %v1445_v63, 16  ;;  %v1112_v48 = vld [vmem:[#allocation2 + $0x68] sm:$0x1] }
 0x10f   : > { %v1109_v23 = vsel %vm3736_vm14, %v991_v8, %v1108_v0  ;;  %v3206_v25 = vpack.c.bf16 %v721_v15, %v721_v15  ;;  %v3204_v26 = vpack.c.bf16 %v719_v35, %v719_v35  ;;  %v3921_v30 = vrot.slane %v1581_v11, 5  ;;  %v3945_v19 = vld [vmem:[#allocation2 + $0x14] sm:$0x1]  ;;  %v1348_v24 = vld [vmem:[#allocation2 + $0x54] sm:$0xe] }
 0x110   : > { %1110 = vst [vmem:[#allocation2 + $0x60] sm:$0xf] %v1109_v23  ;;  %v3925_v49 = vrot.slane %v1602_v16, 4  ;;  %v3927_v36 = vrot.slane %v1605_v21, 5  ;;  %v3101_v38 = vcombine.low %v1445_v63, %v3913_v14  ;;  %v1859_v50 = vshrl.u32 %v1746_v31, 16  ;;  %v3381_v56 = vld [vmem:[%s4901_s5 + $0x10] sm:$0xff]  }
 0x111   : > { %v1011_v42 = vshrl.u32 %v3206_v25, 16  ;;  %v1014_v43 = vshll.u32 %v3206_v25, 16  ;;  %v994_v44 = vshrl.u32 %v3204_v26, 16  ;;  %v997_v46 = vshll.u32 %v3204_v26, 16  ;;  %v3954_v35 = vld [vmem:[#allocation2 + $0x58] sm:$0xf] }
 0x112   : > { %2198 = vrot.lane.b32.xlu0 %v3101_v38, %s3440_s17  ;;  %v1862_v51 = vshll.u32 %v1746_v31, 16  ;;  %v3123_v55 = vcombine.low %v1746_v31, %v3923_v32  ;;  %v3048_v59 = vrot.slane %v1342_v22, 9  ;;  %v1385_v60 = vrot.slane %v3931_v41, 5  ;;  %v1959_v16 = vld [vmem:[#allocation2 + $0x54] sm:$0xe] }
 0x113   : > { %v1013_v54 = vrot.slane %v1011_v42, 7  ;;  %v996_v27 = vrot.slane %v994_v44, 7  ;;  %v3947_v61 = vrot.slane %v1859_v50, 4  ;;  %v1388_v63 = vrot.slane %v3933_v47, 5  ;;  %v3961_v26 = vld [vmem:[#allocation2 + $0x5c] sm:$0x1] }
 0x114   : > { %v3949_v62 = vrot.slane %v1862_v51, 5  ;;  %v3055_v0 = vrot.slane %v1649_v34, 9  ;;  %vm657_vm3 = vcmp.ge.s32.totalorder %v3716_v39, 1  ;;  %vm667_vm13 = vcmp.le.s32.totalorder %v3716_v39, 16  ;;  %v1341_v44 = vld [vmem:[#allocation2] sm:$0xe] }
 0x115   : > { %v1016_v7 = vor.u32 %v1014_v43, %v1013_v54  ;;  %v1018_v8 = vrot.slane %v1013_v54, 4  ;;  %v999_v11 = vor.u32 %v997_v46, %v996_v27  ;;  %v1001_v15 = vrot.slane %v996_v27, 4  ;;  %v3975_v43 = vld [vmem:[#allocation2 + $0x5c] sm:$0x1]  ;;  %v3985_v46 = vld [vmem:[#allocation2 + $0x4] sm:$0xf]  ;;  %vm4024_vm6 = vmand %vm657_vm3, %vm667_vm13 }
 0x116   : > { %2322 = vrot.lane.b32.xlu0 %v3123_v55, %s3439_s30  ;;  %v1386_v21 = vsel %vm3940_vm12, %v3048_v59, %v1385_v60  ;;  %v1387_v22 = vrot.slane %v1385_v60, 4  ;;  %v1683_v23 = vrot.slane %v3870_v20, 5  ;;  %v1686_v25 = vrot.slane %v3945_v19, 5  ;;  %v3989_v54 = vld [vmem:[#allocation2 + $0x8] sm:$0x1] }
 0x117   : > { %v1017_v31 = vsel %vm3762_vm4, %v1009_v45, %v1016_v7  ;;  %v1120_v34 = vsel %vm3625_vm5, %v1018_v8, %v1119_v18  ;;  %v1000_v38 = vsel %vm3762_vm4, %v992_v9, %v999_v11  ;;  %v1113_v42 = vsel %vm3625_vm5, %v1001_v15, %v1112_v48  ;;  %v1958_v18 = vld [vmem:[#allocation2 + $0x48] sm:$0xe]  ;;  %v3999_v11 = vld [vmem:[#allocation2 + $0x50] sm:$0x1]  ;;  %v3253_v15 = vpop.f32.mrf.mxu0  ;;  %v1437_v12 = vld [vmem:[#allocation2 + $0x24] sm:$0xf] }
 0x118   : > { %vm656_vm15 = vcmp.ge.s32.totalorder %v3718_v40, 1  ;;  %vm666_vm1 = vcmp.le.s32.totalorder %v3718_v40, 16  ;;  %1118 = vst.msk [vmem:[#allocation2 + $0x70] sm:$0xf] %vm1049_vm2, %v1017_v31  ;;  %1121 = vst [vmem:[#allocation2 + $0x74] sm:$0x1] %v1120_v34  ;;  %v1389_v2 = vsel %vm3940_vm12, %v1387_v22, %v1388_v63  ;;  %v1684_v45 = vsel %vm3940_vm12, %v3055_v0, %v1683_v23 }
 0x119   : > { %1111 = vst.msk [vmem:[#allocation2 + $0x64] sm:$0xf] %vm1049_vm2, %v1000_v38  ;;  %1114 = vst [vmem:[#allocation2 + $0x68] sm:$0x1] %v1113_v42  ;;  %v1685_v33 = vrot.slane %v1683_v23, 4  ;;  %v3054_v9 = vrot.slane %v1348_v24, 9  ;;  %v3088_v48 = vcombine.low %v1386_v21, %v1389_v2 }
 0x11a   : > { %v1427_v50 = vrot.slane %v3954_v35, 5  ;;  %v1430_v51 = vrot.slane %v3961_v26, 5  ;;  %v3068_v55 = vrot.slane %v1959_v16, 9  ;;  %v2023_v59 = vrot.slane %v3842_v57, 5  ;;  %v1654_v42 = vld [vmem:[#allocation2 + $0x48] sm:$0xe]  ;;  %vm4047_vm7 = vmand %vm656_vm15, %vm666_vm1 }
 0x11b   : > { %v1687_v27 = vsel %vm3940_vm12, %v1685_v33, %v1686_v25  ;;  %v2026_v60 = vrot.slane %v3975_v43, 5  ;;  %v3047_v63 = vrot.slane %v1341_v44, 9  ;;  %2140 = vrot.lane.b32.xlu1 %v3088_v48, %s3441_s18  ;;  %v1378_v8 = vrot.slane %v3985_v46, 5  ;;  %v4078_v52 = vld [vmem:[#allocation2 + $0x28] sm:$0xf] }
 0x11c   : > { %v3111_v0 = vcombine.low %v1684_v45, %v1687_v27  ;;  %v1428_v24 = vsel %vm3940_vm12, %v3054_v9, %v1427_v50  ;;  %v1429_v7 = vrot.slane %v1427_v50, 4  ;;  %v2024_v16 = vsel %vm3940_vm12, %v3068_v55, %v2023_v59  ;;  %v4014_v9 = vld [vmem:[#allocation2 + $0x50] sm:$0x1] }
 0x11d   : > { %v2025_v21 = vrot.slane %v2023_v59, 4  ;;  %v1381_v22 = vrot.slane %v3989_v54, 5  ;;  %v3067_v23 = vrot.slane %v1958_v18, 9  ;;  %v1379_v31 = vsel %vm3940_vm12, %v3047_v63, %v1378_v8  ;;  %v1347_v18 = vld [vmem:[#allocation2 + $0x48] sm:$0xe]  ;;  %v575_v59 = vpop.f32.mrf.mxu0 }
 0x11e   : > { %2266 = vrot.lane.b32.xlu0 %v3111_v0, %s3442_s19  ;;  %v1431_v25 = vsel %vm3940_vm12, %v1429_v7, %v1430_v51  ;;  %v1380_v34 = vrot.slane %v1378_v8, 4  ;;  %v2016_v38 = vrot.slane %v3923_v32, 5  ;;  %v2019_v45 = vrot.slane %v3999_v11, 5  ;;  %v4032_v8 = vld [vmem:[#allocation2 + $0x50] sm:$0x1] }
 0x11f   : > { %v3094_v44 = vcombine.low %v1428_v24, %v1431_v25  ;;  %v2027_v2 = vsel %vm3940_vm12, %v2025_v21, %v2026_v60  ;;  %v584_v33 = vadd.f32 %v3253_v15, %v3681_v13  ;;  %v4028_v60 = vld [vmem:[#allocation2 + $0x4c] sm:$0xf]  ;;  %v3060_v24 = vrot.slane %v1654_v42, 9 }
 0x120   : > { %v3140_v48 = vcombine.low %v2024_v16, %v2027_v2  ;;  %v1382_v50 = vsel %vm3940_vm12, %v1380_v34, %v1381_v22  ;;  %v2017_v51 = vsel %vm3940_vm12, %v3067_v23, %v2016_v38  ;;  %v2018_v55 = vrot.slane %v2016_v38, 4  ;;  %v1740_v22 = vld [vmem:[#allocation2 + $0x24] sm:$0xf] }
 0x121   : > { %2152 = vrot.lane.b32.xlu1 %v3094_v44, %s3441_s18  ;;  %v3087_v63 = vcombine.low %v1379_v31, %v1382_v50  ;;  %v632_v0 = vmax.f32 %v584_v33, 0.0  ;;  %v1718_v7 = vrot.slane %v3891_v53, 5  ;;  %v1721_v15 = vrot.slane %v4014_v9, 5  ;;  %v3254_v33 = vpop.f32.mrf.mxu0 }
 0x122   : > { %2404 = vrot.lane.b32.xlu0 %v3140_v48, %s3443_s20  ;;  %v2020_v39 = vsel %vm3940_vm12, %v2018_v55, %v2019_v45  ;;  %v576_v16 = vadd.f32 %v3681_v13, %v575_v59  ;;  %v3053_v21 = vrot.slane %v1347_v18, 9  ;;  %vm1146_vm8 = vsmask.f32 3328  ;;  %v4057_v48 = vld [vmem:[#allocation2 + $0x28] sm:$0xf] }
 0x123   : > { %v3139_v23 = vcombine.low %v2017_v51, %v2020_v39  ;;  %v712_v25 = vsel %vm4024_vm6, %v632_v0, 0.0  ;;  %v1719_v31 = vsel %vm3940_vm12, %v3060_v24, %v1718_v7  ;;  %v1720_v34 = vrot.slane %v1718_v7, 4 }
 0x124   : > { %vm1147_vm9 = vsmask.f32 7440  ;;  %v3197_v42 = vpack.c.bf16 %v712_v25, %v712_v25  ;;  %v630_v44 = vmax.f32 %v576_v16, 0.0  ;;  %v1420_v2 = vrot.slane %v4028_v60, 5 }
 0x125   : > { %v1423_v45 = vrot.slane %v4032_v8, 5  ;;  %2138 = vrot.lane.b32.xlu1 %v3087_v63, %s3441_s18  ;;  %v1722_v18 = vsel %vm3940_vm12, %v1720_v34, %v1721_v15  ;;  %v587_v40 = vadd.f32 %v3254_v33, %v3681_v13  ;;  %v1787_v50 = vshrl.u32 %v1740_v22, 16  ;;  %vm4094_vm10 = vmor %vm1146_vm8, %vm1147_vm9 }
 0x126   : > { %v1790_v51 = vshll.u32 %v1740_v22, 16  ;;  %2402 = vrot.lane.b32.xlu0 %v3139_v23, %s3443_s20  ;;  %v935_v55 = vshrl.u32 %v3197_v42, 16  ;;  %v938_v59 = vshll.u32 %v3197_v42, 16  ;;  %v3116_v0 = vcombine.low %v1719_v31, %v1722_v18  ;;  %v578_v23 = vpop.f32.mrf.mxu0  ;;  %v1087_v42 = vld [vmem:[#allocation2 + $0x3c] sm:$0xf] }
 0x127   : > { %v710_v24 = vsel %vm4047_vm7, %v630_v44, 0.0  ;;  %v1421_v63 = vsel %vm3940_vm12, %v3053_v21, %v1420_v2  ;;  %v1422_v39 = vrot.slane %v1420_v2, 4  ;;  %v633_v15 = vmax.f32 %v587_v40, 0.0 }
 0x128   : > { %v3195_v7 = vpack.c.bf16 %v710_v24, %v710_v24  ;;  %v937_v16 = vrot.slane %v935_v55, 7  ;;  %v4064_v25 = vrot.slane %v1787_v50, 4  ;;  %v4066_v34 = vrot.slane %v1790_v51, 5 }
 0x129   : > { %2276 = vrot.lane.b32.xlu1 %v3116_v0, %s3442_s19  ;;  %v1424_v18 = vsel %vm3940_vm12, %v1422_v39, %v1423_v45  ;;  %v713_v21 = vsel %vm4024_vm6, %v633_v15, 0.0  ;;  %v3120_v24 = vcombine.low %v1740_v22, %v4057_v48  ;;  %v579_v33 = vadd.f32 %v3681_v13, %v578_v23  ;;  %v1080_v45 = vld [vmem:[#allocation2 + $0x30] sm:$0xf] }
 0x12a   : > { %v918_v31 = vshrl.u32 %v3195_v7, 16  ;;  %v921_v44 = vshll.u32 %v3195_v7, 16  ;;  %v940_v2 = vor.u32 %v938_v59, %v937_v16  ;;  %v941_v40 = vrot.slane %v937_v16, 4  ;;  %v1124_v16 = vld [vmem:[#allocation2 + $0xc] sm:$0xf] }
 0x12b   : > { %v3093_v50 = vcombine.low %v1421_v63, %v1424_v18  ;;  %v3198_v51 = vpack.c.bf16 %v713_v21, %v713_v21  ;;  %v1506_v0 = vshrl.u32 %v1437_v12, 16  ;;  %v1509_v39 = vshll.u32 %v1437_v12, 16 }
 0x12c   : > { %v4074_v55 = vrot.slane %v918_v31, 7  ;;  %v1088_v7 = vsel %vm3736_vm14, %v940_v2, %v1087_v42  ;;  %v631_v13 = vmax.f32 %v579_v33, 0.0  ;;  %v3097_v42 = vcombine.low %v1437_v12, %v4078_v52  ;;  %v1091_v33 = vld [vmem:[#allocation2 + $0x44] sm:$0x1] }
 0x12d   : > { %2150 = vrot.lane.b32.xlu0 %v3093_v50, %s3441_s18  ;;  %v943_v27 = vshrl.u32 %v3198_v51, 16  ;;  %v946_v59 = vshll.u32 %v3198_v51, 16  ;;  %1089 = vst [vmem:[#allocation2 + $0x3c] sm:$0xf] %v1088_v7  ;;  %2316 = vrot.lane.b32.xlu1 %v3120_v24, %s3439_s30  ;;  %v4086_v22 = vrot.slane %v1506_v0, 4  ;;  %v4088_v31 = vrot.slane %v1509_v39, 5 }
 0x12e   : > { %v923_v63 = vor.u32 %v921_v44, %v4074_v55  ;;  %v924_v15 = vrot.slane %v4074_v55, 4  ;;  %v1519_v18 = vshrl.u32 %v4078_v52, 16  ;;  %v711_v2 = vsel %vm4047_vm7, %v631_v13, 0.0 }
 0x12f   : > { %v945_v23 = vrot.slane %v943_v27, 7  ;;  %v1894_v50 = vrot.slane %v1892_v6, 5  ;;  %v1902_v12 = vshll.u32 %v3975_v43, 16  ;;  %v3196_v24 = vpack.c.bf16 %v711_v2, %v711_v2  ;;  %v1136_v27 = vld [vmem:[#allocation2 + $0x54] sm:$0xf] }
 0x130   : > { %v1081_v44 = vsel %vm3736_vm14, %v923_v63, %v1080_v45  ;;  %v1174_v0 = vshrl.u32 %v1124_v16, 16  ;;  %v1177_v45 = vshll.u32 %v1124_v16, 16  ;;  %v1187_v16 = vshrl.u32 %v3931_v41, 16 }
 0x131   : > { %1082 = vst [vmem:[#allocation2 + $0x30] sm:$0xf] %v1081_v44  ;;  %v948_v51 = vor.u32 %v946_v59, %v945_v23  ;;  %v950_v55 = vrot.slane %v945_v23, 4  ;;  %2190 = vrot.lane.b32.xlu0 %v3097_v42, %s3440_s17  ;;  %v1895_v58 = vsel %vm4094_vm10, %v3884_v5, %v1894_v50  ;;  %v1899_v7 = vor.u32 %v3860_v17, %v1894_v50 }
 0x132   : > { %v1904_v38 = vrot.slane %v1902_v12, 5  ;;  %v926_v43 = vshrl.u32 %v3196_v24, 16  ;;  %v929_v59 = vshll.u32 %v3196_v24, 16  ;;  %v1176_v63 = vrot.slane %v1174_v0, 4 }
 0x133   : > { %v949_v57 = vsel %vm3762_vm4, %v941_v40, %v948_v51  ;;  %v1092_v6 = vsel %vm3625_vm5, %v950_v55, %v1091_v33  ;;  %v1900_v39 = vrot.slane %v1899_v7, 4  ;;  %v1179_v13 = vrot.slane %v1177_v45, 5  ;;  %v1084_v40 = vld [vmem:[#allocation2 + $0x38] sm:$0x1] }
 0x134   : > { %1090 = vst.msk [vmem:[#allocation2 + $0x40] sm:$0xf] %vm1049_vm2, %v949_v57  ;;  %1093 = vst [vmem:[#allocation2 + $0x44] sm:$0x1] %v1092_v6  ;;  %v1183_v5 = vshll.u32 %v3931_v41, 16  ;;  %v928_v17 = vrot.slane %v926_v43, 7 }
 0x135   : > { %v1193_v23 = vshll.u32 %v3933_v47, 16  ;;  %v1318_v42 = vshrl.u32 %v1136_v27, 16  ;;  %v1905_v44 = vsel %vm4094_vm10, %v1900_v39, %v1904_v38  ;;  %v1180_v33 = vor.u32 %v1179_v13, %v1176_v63  ;;  %v4126_v6 = vld [vmem:[#allocation2 + $0x18] sm:$0xf] }
 0x136   : > { %v1185_v2 = vrot.slane %v1183_v5, 5  ;;  %v1321_v50 = vshll.u32 %v1136_v27, 16  ;;  %v931_v12 = vor.u32 %v929_v59, %v928_v17  ;;  %v933_v51 = vrot.slane %v928_v17, 4 }
 0x137   : > { %v3132_v55 = vcombine.low %v1895_v58, %v1905_v44  ;;  %v1189_v24 = vrot.slane %v1187_v16, 4  ;;  %v1181_v0 = vrot.slane %v1180_v33, 4  ;;  %v1195_v7 = vrot.slane %v1193_v23, 5  ;;  %v4136_v16 = vld [vmem:[#allocation2 + $0x1c] sm:$0xf] }
 0x138   : > { %v1320_v45 = vrot.slane %v1318_v42, 4  ;;  %v1323_v57 = vrot.slane %v1321_v50, 5  ;;  %v932_v41 = vsel %vm3762_vm4, %v924_v15, %v931_v12  ;;  %v1085_v47 = vsel %vm3625_vm5, %v933_v51, %v1084_v40  ;;  %v4145_v40 = vld [vmem:[#allocation2 + $0x1c] sm:$0xf]  ;;  %v4151_v50 = vld [vmem:[#allocation2 + $0x60] sm:$0xf] }
 0x139   : > { %2364 = vrot.lane.b32.xlu1 %v3132_v55, %s3444_s21  ;;  %v1190_v38 = vor.u32 %v1189_v24, %v1185_v2  ;;  %v1327_v27 = vshll.u32 %v3954_v35, 16  ;;  %1083 = vst.msk [vmem:[#allocation2 + $0x34] sm:$0xf] %vm1049_vm2, %v932_v41  ;;  %1086 = vst [vmem:[#allocation2 + $0x38] sm:$0x1] %v1085_v47  ;;  %v1186_v58 = vsel %vm4094_vm10, %v1181_v0, %v1185_v2  ;;  %v1331_v37 = vshrl.u32 %v3954_v35, 16 }
 0x13a   : > { %v1324_v43 = vor.u32 %v1323_v57, %v1320_v45  ;;  %v1337_v3 = vshll.u32 %v3961_v26, 16  ;;  %v1469_v39 = vrot.slane %v1467_v29, 5  ;;  %v1477_v63 = vshll.u32 %v3945_v19, 16  ;;  %v1738_v29 = vld [vmem:[#allocation2 + $0x18] sm:$0xf] }
 0x13b   : > { %v1191_v15 = vrot.slane %v1190_v38, 4  ;;  %v1329_v59 = vrot.slane %v1327_v27, 5  ;;  %v1333_v5 = vrot.slane %v1331_v37, 4  ;;  %v1482_v23 = vshrl.u32 %v4126_v6, 16  ;;  %v4160_v45 = vld [vmem:[#allocation2 + $0x64] sm:$0xf] }
 0x13c   : > { %v1325_v13 = vrot.slane %v1324_v43, 4  ;;  %v1339_v17 = vrot.slane %v1337_v3, 5  ;;  %v1470_v35 = vsel %vm4094_vm10, %v3904_v1, %v1469_v39  ;;  %v1474_v26 = vor.u32 %v3906_v4, %v1469_v39  ;;  %v1122_v37 = vld [vmem:[#allocation2] sm:$0xf] }
 0x13d   : > { %v1196_v42 = vsel %vm4094_vm10, %v1191_v15, %v1195_v7  ;;  %v1479_v20 = vrot.slane %v1477_v63, 5  ;;  %v1334_v33 = vor.u32 %v1333_v5, %v1329_v59  ;;  %v4149_v2 = vrot.slane %v1482_v23, 4 }
 0x13e   : > { %v3080_v19 = vcombine.low %v1186_v58, %v1196_v42  ;;  %v1330_v44 = vsel %vm4094_vm10, %v1325_v13, %v1329_v59  ;;  %v1475_v12 = vrot.slane %v1474_v26, 4  ;;  %v1485_v51 = vshll.u32 %v4126_v6, 16 }
 0x13f   : > { %v1495_v1 = vshrl.u32 %v4136_v16, 16  ;;  %v3096_v4 = vcombine.low %v4126_v6, %v4136_v16  ;;  %v1335_v55 = vrot.slane %v1334_v33, 4  ;;  %v1776_v24 = vshrl.u32 %v4145_v40, 16  ;;  %v1134_v33 = vld [vmem:[#allocation2 + $0x48] sm:$0xf] }
 0x140   : > { %2100 = vrot.lane.b32.xlu0 %v3080_v19, %s3445_s22  ;;  %v3119_v0 = vcombine.low %v1738_v29, %v4145_v40  ;;  %v1763_v7 = vshrl.u32 %v1738_v29, 16  ;;  %v1480_v57 = vsel %vm4094_vm10, %v1475_v12, %v1479_v20  ;;  %v4164_v41 = vrot.slane %v1485_v51, 5 }
 0x141   : > { %v1766_v47 = vshll.u32 %v1738_v29, 16  ;;  %v1626_v38 = vshrl.u32 %v4151_v50, 16  ;;  %v1340_v27 = vsel %vm4094_vm10, %v1335_v55, %v1339_v17  ;;  %v3103_v6 = vcombine.low %v1470_v35, %v1480_v57 }
 0x142   : > { %v4169_v58 = vrot.slane %v1763_v7, 4  ;;  %v1629_v43 = vshll.u32 %v4151_v50, 16  ;;  %v3086_v3 = vcombine.low %v1330_v44, %v1340_v27  ;;  %v1639_v39 = vshrl.u32 %v4160_v45, 16 }
 0x143   : > { %v4172_v15 = vrot.slane %v1766_v47, 5  ;;  %v4174_v59 = vrot.slane %v1626_v38, 4  ;;  %v3102_v13 = vcombine.low %v4151_v50, %v4160_v45  ;;  %v1584_v5 = vor.u32 %v3921_v30, %v3911_v10 }
 0x144   : > { %2226 = vrot.lane.b32.xlu0 %v3103_v6, %s3446_s23  ;;  %v4178_v63 = vrot.slane %v1629_v43, 5  ;;  %v1587_v17 = vshll.u32 %v3891_v53, 16  ;;  %2112 = vrot.lane.b32.xlu1 %v3086_v3, %s3445_s22  ;;  %v1593_v23 = vrot.slane %v1591_v28, 4  ;;  %v1597_v42 = vshll.u32 %v4014_v9, 16 }
 0x145   : > { %v1150_v35 = vshrl.u32 %v1122_v37, 16  ;;  %v1153_v26 = vshll.u32 %v1122_v37, 16  ;;  %v1585_v20 = vrot.slane %v1584_v5, 4  ;;  %v1159_v19 = vshll.u32 %v3985_v46, 16 }
 0x146   : > { %v1589_v29 = vrot.slane %v1587_v17, 5  ;;  %v1163_v44 = vshrl.u32 %v3985_v46, 16  ;;  %v1599_v50 = vrot.slane %v1597_v42, 5  ;;  %v1169_v12 = vshll.u32 %v3989_v54, 16 }
 0x147   : > { %v1152_v10 = vrot.slane %v1150_v35, 4  ;;  %v1155_v30 = vrot.slane %v1153_v26, 5  ;;  %v1161_v9 = vrot.slane %v1159_v19, 5  ;;  %v1294_v57 = vshrl.u32 %v1134_v33, 16 }
 0x148   : > { %2314 = vrot.lane.b32.xlu0 %v3119_v0, %s3439_s30  ;;  %v1590_v53 = vsel %vm4094_vm10, %v1585_v20, %v1589_v29  ;;  %v1594_v28 = vor.u32 %v1593_v23, %v1589_v29  ;;  %v1165_v51 = vrot.slane %v1163_v44, 4  ;;  %2188 = vrot.lane.b32.xlu1 %v3096_v4, %s3440_s17  ;;  %v1171_v7 = vrot.slane %v1169_v12, 5  ;;  %v4209_v44 = vld [vmem:[#allocation2 + $0x28] sm:$0xf] }
 0x149   : > { %v1156_v55 = vor.u32 %v1155_v30, %v1152_v10  ;;  %v1297_v46 = vshll.u32 %v1134_v33, 16  ;;  %v1303_v27 = vshll.u32 %v4028_v60, 16  ;;  %v1307_v54 = vshrl.u32 %v4028_v60, 16  ;;  %v1344_v60 = vld [vmem:[#allocation2 + $0x24] sm:$0xe] }
 0x14a   : > { %v1595_v47 = vrot.slane %v1594_v28, 4  ;;  %v1166_v38 = vor.u32 %v1165_v51, %v1161_v9  ;;  %v1296_v0 = vrot.slane %v1294_v57, 4  ;;  %v1313_v37 = vshll.u32 %v4032_v8, 16  ;;  %v4211_v33 = vld [vmem:[#allocation2 + $0x2c] sm:$0x1] }
 0x14b   : > { %v1157_v6 = vrot.slane %v1156_v55, 4  ;;  %v1299_v43 = vrot.slane %v1297_v46, 5  ;;  %v1305_v4 = vrot.slane %v1303_v27, 5  ;;  %v1309_v17 = vrot.slane %v1307_v54, 4  ;;  %v4228_v54 = vld [vmem:[#allocation2 + $0x20] sm:$0x1] }
 0x14c   : > { %v1600_v3 = vsel %vm4094_vm10, %v1595_v47, %v1599_v50  ;;  %v1167_v5 = vrot.slane %v1166_v38, 4  ;;  %2200 = vrot.lane.b32.xlu1 %v3102_v13, %s3440_s17  ;;  %v1315_v26 = vrot.slane %v1313_v37, 5  ;;  %v1865_v8 = vor.u32 %v3949_v62, %v3947_v61 }
 0x14d   : > { %v3108_v23 = vcombine.low %v1590_v53, %v1600_v3  ;;  %v1162_v42 = vsel %vm4094_vm10, %v1157_v6, %v1161_v9  ;;  %v1300_v35 = vor.u32 %v1299_v43, %v1296_v0  ;;  %v1310_v29 = vor.u32 %v1309_v17, %v1305_v4  ;;  %v1955_v53 = vld [vmem:[#allocation2 + $0x24] sm:$0xe] }
 0x14e   : > { %v1172_v20 = vsel %vm4094_vm10, %v1167_v5, %v1171_v7  ;;  %v1868_v19 = vshll.u32 %v3923_v32, 16  ;;  %v4939_v10 = vshrl.u32 %v3923_v32, 16  ;;  %v1878_v12 = vshll.u32 %v3999_v11, 16  ;;  %v4216_v7 = vld [vmem:[#allocation2 + $0x2c] sm:$0x1] }
 0x14f   : > { %v3079_v13 = vcombine.low %v1162_v42, %v1172_v20  ;;  %v1301_v50 = vrot.slane %v1300_v35, 4  ;;  %v1311_v28 = vrot.slane %v1310_v29, 4  ;;  %v1866_v9 = vrot.slane %v1865_v8, 4  ;;  %v1650_v11 = vld [vmem:[#allocation2 + $0x18] sm:$0xe] }
 0x150   : > { %v1874_v30 = vrot.slane %v4939_v10, 4  ;;  %v1870_v51 = vrot.slane %v1868_v19, 5  ;;  %v3050_v55 = vrot.slane %v1344_v60, 9  ;;  %2236 = vrot.lane.b32.xlu1 %v3108_v23, %s3446_s23  ;;  %v1880_v62 = vrot.slane %v1878_v12, 5  ;;  %v1651_v23 = vld [vmem:[#allocation2 + $0x24] sm:$0xe] }
 0x151   : > { %2098 = vrot.lane.b32.xlu0 %v3079_v13, %s3445_s22  ;;  %v1306_v61 = vsel %vm4094_vm10, %v1301_v50, %v1305_v4  ;;  %v1399_v32 = vrot.slane %v4209_v44, 5  ;;  %v1402_v57 = vrot.slane %v4211_v33, 5  ;;  %v1316_v46 = vsel %vm4094_vm10, %v1311_v28, %v1315_v26  ;;  %v4241_v20 = vld [vmem:[#allocation2 + $0x2c] sm:$0x1]  ;;  %v1744_v29 = vld [vmem:[#allocation2 + $0x3c] sm:$0xf] }
 0x152   : > { %v1871_v47 = vsel %vm4094_vm10, %v1866_v9, %v1870_v51  ;;  %v1875_v38 = vor.u32 %v1874_v30, %v1870_v51  ;;  %v3064_v27 = vrot.slane %v1955_v53, 9  ;;  %v3085_v6 = vcombine.low %v1306_v61, %v1316_v46  ;;  %v4250_v28 = vld [vmem:[#allocation2 + $0x40] sm:$0xf]  ;;  %v1954_v9 = vld [vmem:[#allocation2 + $0x18] sm:$0xe] }
 0x153   : > { %v1400_v0 = vsel %vm3940_vm12, %v3050_v55, %v1399_v32  ;;  %v1401_v43 = vrot.slane %v1399_v32, 4  ;;  %v1995_v37 = vrot.slane %v4057_v48, 5  ;;  %v1998_v5 = vrot.slane %v4216_v7, 5  ;;  %v4255_v32 = vld [vmem:[#allocation2 + $0x20] sm:$0x1] }
 0x154   : > { %v1876_v3 = vrot.slane %v1875_v38, 4  ;;  %v3056_v4 = vrot.slane %v1650_v11, 9  ;;  %v1690_v17 = vrot.slane %v4136_v16, 5  ;;  %2110 = vrot.lane.b32.xlu1 %v3085_v6, %s3445_s22  ;;  %v1693_v60 = vrot.slane %v4228_v54, 5 }
 0x155   : > { %v1403_v42 = vsel %vm3940_vm12, %v1401_v43, %v1402_v57  ;;  %v1996_v35 = vsel %vm3940_vm12, %v3064_v27, %v1995_v37  ;;  %v1997_v26 = vrot.slane %v1995_v37, 4  ;;  %v3057_v12 = vrot.slane %v1651_v23, 9  ;;  %v1343_v43 = vld [vmem:[#allocation2 + $0x18] sm:$0xe] }
 0x156   : > { %v1881_v8 = vsel %vm4094_vm10, %v1876_v3, %v1880_v62  ;;  %v3090_v19 = vcombine.low %v1400_v0, %v1403_v42  ;;  %v1691_v13 = vsel %vm3940_vm12, %v3056_v4, %v1690_v17  ;;  %v1692_v50 = vrot.slane %v1690_v17, 4  ;;  %v4271_v17 = vld [vmem:[#allocation2 + $0x20] sm:$0x1] }
 0x157   : > { %v3131_v10 = vcombine.low %v1871_v47, %v1881_v8  ;;  %v1999_v30 = vsel %vm3940_vm12, %v1997_v26, %v1998_v5  ;;  %v1697_v53 = vrot.slane %v4078_v52, 5  ;;  %v1700_v61 = vrot.slane %v4241_v20, 5 }
 0x158   : > { %v3136_v51 = vcombine.low %v1996_v35, %v1999_v30  ;;  %v1694_v55 = vsel %vm3940_vm12, %v1692_v50, %v1693_v60  ;;  %v1835_v62 = vshrl.u32 %v1744_v29, 16  ;;  %2144 = vrot.lane.b32.xlu1 %v3090_v19, %s3441_s18  ;;  %v1838_v47 = vshll.u32 %v1744_v29, 16  ;;  %v4283_v50 = vld [vmem:[#allocation2 + $0x1c] sm:$0xf] }
 0x159   : > { %2362 = vrot.lane.b32.xlu0 %v3131_v10, %s3444_s21  ;;  %v3112_v57 = vcombine.low %v1691_v13, %v1694_v55  ;;  %v1698_v11 = vsel %vm3940_vm12, %v3057_v12, %v1697_v53  ;;  %v1699_v46 = vrot.slane %v1697_v53, 4  ;;  %v1848_v27 = vshrl.u32 %v4250_v28, 16  ;;  %v4289_v55 = vld [vmem:[#allocation2 + $0x3c] sm:$0xf] }
 0x15a   : > { %v4261_v38 = vrot.slane %v1835_v62, 4  ;;  %v3122_v6 = vcombine.low %v1744_v29, %v4250_v28  ;;  %v3063_v0 = vrot.slane %v1954_v9, 9  ;;  %v4267_v3 = vrot.slane %v1838_v47, 5  ;;  %v1128_v29 = vld [vmem:[#allocation2 + $0x24] sm:$0xf] }
 0x15b   : > { %v1701_v37 = vsel %vm3940_vm12, %v1699_v46, %v1700_v61  ;;  %v1988_v5 = vrot.slane %v4145_v40, 5  ;;  %v1991_v4 = vrot.slane %v4255_v32, 5  ;;  %v1793_v42 = vor.u32 %v4066_v34, %v4064_v25 }
 0x15c   : > { %v3113_v23 = vcombine.low %v1698_v11, %v1701_v37  ;;  %v1796_v35 = vshll.u32 %v4057_v48, 16  ;;  %v4940_v26 = vshrl.u32 %v4057_v48, 16  ;;  %2268 = vrot.lane.b32.xlu1 %v3112_v57, %s3442_s19  ;;  %v1806_v13 = vshll.u32 %v4216_v7, 16 }
 0x15d   : > { %2396 = vrot.lane.b32.xlu0 %v3136_v51, %s3443_s20  ;;  %v1989_v8 = vsel %vm3940_vm12, %v3063_v0, %v1988_v5  ;;  %v1990_v19 = vrot.slane %v1988_v5, 4  ;;  %v3049_v10 = vrot.slane %v1343_v43, 9  ;;  %v1794_v25 = vrot.slane %v1793_v42, 4 }
 0x15e   : > { %v1802_v60 = vrot.slane %v4940_v26, 4  ;;  %v1798_v34 = vrot.slane %v1796_v35, 5  ;;  %v1392_v30 = vrot.slane %v4283_v50, 5  ;;  %v1395_v48 = vrot.slane %v4271_v17, 5 }
 0x15f   : > { %v1992_v12 = vsel %vm3940_vm12, %v1990_v19, %v1991_v4  ;;  %v1808_v53 = vrot.slane %v1806_v13, 5  ;;  %v1222_v9 = vshrl.u32 %v1128_v29, 16  ;;  %v1225_v51 = vshll.u32 %v1128_v29, 16 }
 0x160   : > { %v3135_v61 = vcombine.low %v1989_v8, %v1992_v12  ;;  %v1799_v7 = vsel %vm4094_vm10, %v1794_v25, %v1798_v34  ;;  %v1803_v62 = vor.u32 %v1802_v60, %v1798_v34  ;;  %v1393_v57 = vsel %vm3940_vm12, %v3049_v10, %v1392_v30  ;;  %2320 = vrot.lane.b32.xlu1 %v3122_v6, %s3439_s30  ;;  %v4306_v60 = vld [vmem:[#allocation2 + $0x30] sm:$0xf] }
 0x161   : > { %2270 = vrot.lane.b32.xlu0 %v3113_v23, %s3442_s19  ;;  %v1394_v11 = vrot.slane %v1392_v30, 4  ;;  %v1224_v46 = vrot.slane %v1222_v9, 4  ;;  %v1227_v47 = vrot.slane %v1225_v51, 5  ;;  %v1231_v0 = vshll.u32 %v4209_v44, 16  ;;  %v4303_v23 = vld [vmem:[#allocation2 + $0x40] sm:$0xf] }
 0x162   : > { %v1804_v43 = vrot.slane %v1803_v62, 4  ;;  %v1235_v37 = vshrl.u32 %v4209_v44, 16  ;;  %v1241_v5 = vshll.u32 %v4211_v33, 16  ;;  %v1554_v4 = vshrl.u32 %v4289_v55, 16  ;;  %v4310_v33 = vld [vmem:[#allocation2 + $0x34] sm:$0xf] }
 0x163   : > { %v1396_v42 = vsel %vm3940_vm12, %v1394_v11, %v1395_v48  ;;  %v1228_v35 = vor.u32 %v1227_v47, %v1224_v46  ;;  %v1233_v26 = vrot.slane %v1231_v0, 5  ;;  %v1557_v6 = vshll.u32 %v4289_v55, 16 }
 0x164   : > { %v1809_v29 = vsel %vm4094_vm10, %v1804_v43, %v1808_v53  ;;  %v3089_v8 = vcombine.low %v1393_v57, %v1396_v42  ;;  %v1237_v44 = vrot.slane %v1235_v37, 4  ;;  %v1243_v19 = vrot.slane %v1241_v5, 5  ;;  %v4341_v37 = vld [vmem:[#allocation2 + $0x30] sm:$0xf]  ;;  %v4346_v42 = vld [vmem:[#allocation2 + $0x34] sm:$0xf] }
 0x165   : > { %2394 = vrot.lane.b32.xlu0 %v3135_v61, %s3443_s20  ;;  %v3128_v13 = vcombine.low %v1799_v7, %v1809_v29  ;;  %v1229_v10 = vrot.slane %v1228_v35, 4  ;;  %v4313_v25 = vrot.slane %v1554_v4, 4  ;;  %v4315_v34 = vrot.slane %v1557_v6, 5  ;;  %v4358_v29 = vld [vmem:[#allocation2 + $0x18] sm:$0xf] }
 0x166   : > { %v1238_v30 = vor.u32 %v1237_v44, %v1233_v26  ;;  %v1567_v48 = vshrl.u32 %v4303_v23, 16  ;;  %v3099_v12 = vcombine.low %v4289_v55, %v4303_v23  ;;  %v1530_v53 = vshrl.u32 %v4306_v60, 16 }
 0x167   : > { %2356 = vrot.lane.b32.xlu1 %v3128_v13, %s3444_s21  ;;  %v1234_v9 = vsel %vm4094_vm10, %v1229_v10, %v1233_v26  ;;  %v1533_v51 = vshll.u32 %v4306_v60, 16  ;;  %v1543_v61 = vshrl.u32 %v4310_v33, 16  ;;  %v3098_v7 = vcombine.low %v4306_v60, %v4310_v33 }
 0x168   : > { %v1239_v62 = vrot.slane %v1238_v30, 4  ;;  %v4328_v57 = vrot.slane %v1530_v53, 4  ;;  %v1512_v55 = vor.u32 %v4088_v31, %v4086_v22  ;;  %v1515_v11 = vshll.u32 %v4078_v52, 16 }
 0x169   : > { %2142 = vrot.lane.b32.xlu0 %v3089_v8, %s3441_s18  ;;  %v4334_v46 = vrot.slane %v1533_v51, 5  ;;  %v1521_v47 = vrot.slane %v1519_v18, 4  ;;  %v1525_v0 = vshll.u32 %v4241_v20, 16  ;;  %v1488_v43 = vor.u32 %v4164_v41, %v4149_v2  ;;  %v4353_v2 = vld [vmem:[%s4903_s7] sm:$0x3] }
 0x16a   : > { %v1244_v5 = vsel %vm4094_vm10, %v1239_v62, %v1243_v19  ;;  %v1513_v22 = vrot.slane %v1512_v55, 4  ;;  %v1517_v31 = vrot.slane %v1515_v11, 5  ;;  %v1491_v4 = vshll.u32 %v4136_v16, 16  ;;  %3312 = vmatprep.subr.msk.bf16.mxu0 %vm505_vm0, %v4353_v2 }
 0x16b   : > { %v3082_v35 = vcombine.low %v1234_v9, %v1244_v5  ;;  %v1527_v26 = vrot.slane %v1525_v0, 5  ;;  %v1489_v52 = vrot.slane %v1488_v43, 4  ;;  %v1497_v18 = vrot.slane %v1495_v1, 4 }
 0x16c   : > { %v1518_v41 = vsel %vm4094_vm10, %v1513_v22, %v1517_v31  ;;  %v1522_v20 = vor.u32 %v1521_v47, %v1517_v31  ;;  %v1493_v6 = vrot.slane %v1491_v4, 5  ;;  %v1501_v60 = vshll.u32 %v4228_v54, 16 }
 0x16d   : > { %2104 = vrot.lane.b32.xlu1 %v3082_v35, %s3445_s22  ;;  %2194 = vrot.lane.b32.xlu0 %v3099_v12, %s3440_s17  ;;  %v1811_v16 = vshrl.u32 %v4341_v37, 16  ;;  %v1814_v1 = vshll.u32 %v4341_v37, 16  ;;  %v1824_v8 = vshrl.u32 %v4346_v42, 16  ;;  %v3121_v44 = vcombine.low %v4341_v37, %v4346_v42  ;;  %v1346_v35 = vld [vmem:[#allocation2 + $0x3c] sm:$0xe] }
 0x16e   : > { %v1523_v19 = vrot.slane %v1522_v20, 4  ;;  %v1494_v54 = vsel %vm4094_vm10, %v1489_v52, %v1493_v6  ;;  %v1498_v13 = vor.u32 %v1497_v18, %v1493_v6  ;;  %v1503_v10 = vrot.slane %v1501_v60, 5  ;;  %v4389_v18 = vld [vmem:[#allocation2 + $0x44] sm:$0x1] }
 0x16f   : > { %v4371_v30 = vrot.slane %v1811_v16, 4  ;;  %v4373_v53 = vrot.slane %v1814_v1, 5  ;;  %v1198_v12 = vshrl.u32 %v4358_v29, 16  ;;  %v1201_v9 = vshll.u32 %v4358_v29, 16  ;;  %v4394_v16 = vld [vmem:[#allocation2 + $0x40] sm:$0xf] }
 0x170   : > { %v1528_v51 = vsel %vm4094_vm10, %v1523_v19, %v1527_v26  ;;  %v1499_v62 = vrot.slane %v1498_v13, 4  ;;  %v1207_v55 = vshll.u32 %v4283_v50, 16  ;;  %v1211_v11 = vshrl.u32 %v4283_v50, 16 }
 0x171   : > { %2192 = vrot.lane.b32.xlu1 %v3098_v7, %s3440_s17  ;;  %v3105_v47 = vcombine.low %v1518_v41, %v1528_v51  ;;  %v1200_v0 = vrot.slane %v1198_v12, 4  ;;  %v1203_v43 = vrot.slane %v1201_v9, 5  ;;  %v1217_v37 = vshll.u32 %v4271_v17, 16  ;;  %v1957_v41 = vld [vmem:[#allocation2 + $0x3c] sm:$0xe] }
 0x172   : > { %v1504_v5 = vsel %vm4094_vm10, %v1499_v62, %v1503_v10  ;;  %v1209_v22 = vrot.slane %v1207_v55, 5  ;;  %v1213_v31 = vrot.slane %v1211_v11, 4  ;;  %v1769_v4 = vor.u32 %v4172_v15, %v4169_v58  ;;  %v1652_v51 = vld [vmem:[#allocation2 + $0x30] sm:$0xe]  ;;  %v4406_v55 = vld [vmem:[#allocation2 + $0x38] sm:$0x1] }
 0x173   : > { %2230 = vrot.lane.b32.xlu0 %v3105_v47, %s3446_s23  ;;  %v3104_v26 = vcombine.low %v1494_v54, %v1504_v5  ;;  %v1204_v50 = vor.u32 %v1203_v43, %v1200_v0  ;;  %v1219_v52 = vrot.slane %v1217_v37, 5  ;;  %v1772_v7 = vshll.u32 %v4145_v40, 16  ;;  %v1757_v54 = vld [vmem:[#allocation2 + $0x44] sm:$0x1] }
 0x174   : > { %v1214_v17 = vor.u32 %v1213_v31, %v1209_v22  ;;  %v1770_v20 = vrot.slane %v1769_v4, 4  ;;  %v1778_v6 = vrot.slane %v1776_v24, 4  ;;  %v1782_v60 = vshll.u32 %v4255_v32, 16  ;;  %v1653_v31 = vld [vmem:[#allocation2 + $0x3c] sm:$0xe] }
 0x175   : > { %2228 = vrot.lane.b32.xlu1 %v3104_v26, %s3446_s23  ;;  %v1205_v58 = vrot.slane %v1204_v50, 4  ;;  %v1774_v15 = vrot.slane %v1772_v7, 5  ;;  %v3052_v1 = vrot.slane %v1346_v35, 9  ;;  %v1413_v19 = vrot.slane %v4394_v16, 5 }
 0x176   : > { %v1215_v13 = vrot.slane %v1214_v17, 4  ;;  %v1784_v10 = vrot.slane %v1782_v60, 5  ;;  %v1416_v12 = vrot.slane %v4389_v18, 5  ;;  %v3066_v9 = vrot.slane %v1957_v41, 9 }
 0x177   : > { %2318 = vrot.lane.b32.xlu0 %v3121_v44, %s3439_s30  ;;  %v1210_v40 = vsel %vm4094_vm10, %v1205_v58, %v1209_v22  ;;  %v1775_v24 = vsel %vm4094_vm10, %v1770_v20, %v1774_v15  ;;  %v1779_v32 = vor.u32 %v1778_v6, %v1774_v15  ;;  %v1414_v62 = vsel %vm3940_vm12, %v3052_v1, %v1413_v19  ;;  %v1956_v1 = vld [vmem:[#allocation2 + $0x30] sm:$0xe] }
 0x178   : > { %v1220_v11 = vsel %vm4094_vm10, %v1215_v13, %v1219_v52  ;;  %v1415_v47 = vrot.slane %v1413_v19, 4  ;;  %v2009_v0 = vrot.slane %v4250_v28, 5  ;;  %v2012_v43 = vrot.slane %v1757_v54, 5  ;;  %v4417_v52 = vld [vmem:[#allocation2 + $0x44] sm:$0x1] }
 0x179   : > { %v3081_v44 = vcombine.low %v1210_v40, %v1220_v11  ;;  %v1780_v37 = vrot.slane %v1779_v32, 4  ;;  %v3058_v5 = vrot.slane %v1652_v51, 9  ;;  %v1704_v22 = vrot.slane %v4310_v33, 5 }
 0x17a   : > { %v1417_v4 = vsel %vm3940_vm12, %v1415_v47, %v1416_v12  ;;  %v2010_v35 = vsel %vm3940_vm12, %v3066_v9, %v2009_v0  ;;  %v2011_v26 = vrot.slane %v2009_v0, 4  ;;  %v1707_v50 = vrot.slane %v4406_v55, 5  ;;  %v4432_v9 = vld [vmem:[#allocation2 + $0x38] sm:$0x1] }
 0x17b   : > { %2102 = vrot.lane.b32.xlu1 %v3081_v44, %s3445_s22  ;;  %v1785_v7 = vsel %vm4094_vm10, %v1780_v37, %v1784_v10  ;;  %v3092_v41 = vcombine.low %v1414_v62, %v1417_v4  ;;  %v1705_v17 = vsel %vm3940_vm12, %v3058_v5, %v1704_v22  ;;  %v1706_v20 = vrot.slane %v1704_v22, 4  ;;  %v4438_v62 = vld [vmem:[#allocation2 + $0x3c] sm:$0xf] }
 0x17c   : > { %v3127_v6 = vcombine.low %v1775_v24, %v1785_v7  ;;  %v2013_v60 = vsel %vm3940_vm12, %v2011_v26, %v2012_v43  ;;  %v3059_v58 = vrot.slane %v1653_v31, 9  ;;  %v1711_v15 = vrot.slane %v4303_v23, 5 }
 0x17d   : > { %v3138_v19 = vcombine.low %v2010_v35, %v2013_v60  ;;  %v1708_v13 = vsel %vm3940_vm12, %v1706_v20, %v1707_v50  ;;  %v1714_v12 = vrot.slane %v4417_v52, 5  ;;  %v1841_v10 = vor.u32 %v4267_v3, %v4261_v38  ;;  %v1345_v35 = vld [vmem:[#allocation2 + $0x30] sm:$0xe]  ;;  %v4454_v50 = vpop.permute.xlu0 %2186 }
 0x17e   : > { %2354 = vrot.lane.b32.xlu0 %v3127_v6, %s3444_s21  ;;  %v3114_v51 = vcombine.low %v1705_v17, %v1708_v13  ;;  %v1712_v40 = vsel %vm3940_vm12, %v3059_v58, %v1711_v15  ;;  %v1713_v24 = vrot.slane %v1711_v15, 4  ;;  %v1844_v32 = vshll.u32 %v4250_v28, 16  ;;  %v4459_v6 = vld [vmem:[#allocation2 + $0x38] sm:$0x1] }
 0x17f   : > { %2148 = vrot.lane.b32.xlu1 %v3092_v41, %s3441_s18  ;;  %v1842_v11 = vrot.slane %v1841_v10, 4  ;;  %v1850_v47 = vrot.slane %v1848_v27, 4  ;;  %v1854_v38 = vshll.u32 %v1757_v54, 16  ;;  %v3065_v3 = vrot.slane %v1956_v1, 9 }
 0x180   : > { %v1715_v0 = vsel %vm3940_vm12, %v1713_v24, %v1714_v12  ;;  %v1846_v43 = vrot.slane %v1844_v32, 5  ;;  %v2002_v44 = vrot.slane %v4346_v42, 5  ;;  %v2005_v37 = vrot.slane %v4432_v9, 5 }
 0x181   : > { %v3115_v5 = vcombine.low %v1712_v40, %v1715_v0  ;;  %v1856_v22 = vrot.slane %v1854_v38, 5  ;;  %v1270_v31 = vshrl.u32 %v4438_v62, 16  ;;  %v1273_v4 = vshll.u32 %v4438_v62, 16  ;;  %v4473_v0 = vpop.permute.xlu1 %2324 }
 0x182   : > { %2400 = vrot.lane.b32.xlu0 %v3138_v19, %s3443_s20  ;;  %v1847_v28 = vsel %vm4094_vm10, %v1842_v11, %v1846_v43  ;;  %v1851_v27 = vor.u32 %v1850_v47, %v1846_v43  ;;  %v2003_v54 = vsel %vm3940_vm12, %v3065_v3, %v2002_v44  ;;  %v2004_v26 = vrot.slane %v2002_v44, 4 }
 0x183   : > { %2272 = vrot.lane.b32.xlu1 %v3114_v51, %s3442_s19  ;;  %v1272_v7 = vrot.slane %v1270_v31, 4  ;;  %v1275_v41 = vrot.slane %v1273_v4, 5  ;;  %v1279_v17 = vshll.u32 %v4394_v16, 16  ;;  %v1283_v20 = vshrl.u32 %v4394_v16, 16  ;;  %v4464_v51 = vld [vmem:[#allocation2 + $0x34] sm:$0xf] }
 0x184   : > { %v1852_v60 = vrot.slane %v1851_v27, 4  ;;  %v2006_v58 = vsel %vm3940_vm12, %v2004_v26, %v2005_v37  ;;  %v1289_v15 = vshll.u32 %v4389_v18, 16  ;;  %v3051_v1 = vrot.slane %v1345_v35, 9 }
 0x185   : > { %v3137_v19 = vcombine.low %v2003_v54, %v2006_v58  ;;  %v1276_v13 = vor.u32 %v1275_v41, %v1272_v7  ;;  %v1281_v12 = vrot.slane %v1279_v17, 5  ;;  %v1285_v10 = vrot.slane %v1283_v20, 4 }
 0x186   : > { %2274 = vrot.lane.b32.xlu0 %v3115_v5, %s3442_s19  ;;  %v1857_v40 = vsel %vm4094_vm10, %v1852_v60, %v1856_v22  ;;  %v1291_v24 = vrot.slane %v1289_v15, 5  ;;  %v1406_v32 = vrot.slane %v4464_v51, 5  ;;  %v1409_v11 = vrot.slane %v4459_v6, 5  ;;  %v4480_v22 = vpop.permute.xlu0 %2198 }
 0x187   : > { %v3130_v47 = vcombine.low %v1847_v28, %v1857_v40  ;;  %v1277_v38 = vrot.slane %v1276_v13, 4  ;;  %v1286_v18 = vor.u32 %v1285_v10, %v1281_v12  ;;  %v1536_v3 = vor.u32 %v4334_v46, %v4328_v57  ;;  %v4517_v40 = vld [vmem:[#allocation2 + $0x30] sm:$0xf] }
 0x188   : > { %v1407_v43 = vsel %vm3940_vm12, %v3051_v1, %v1406_v32  ;;  %v1408_v44 = vrot.slane %v1406_v32, 4  ;;  %v1539_v37 = vshll.u32 %v4310_v33, 16  ;;  %v1545_v5 = vrot.slane %v1543_v61, 4  ;;  %v4504_v1 = vpop.permute.xlu1 %2196 }
 0x189   : > { %2360 = vrot.lane.b32.xlu1 %v3130_v47, %s3444_s21  ;;  %v1282_v31 = vsel %vm4094_vm10, %v1277_v38, %v1281_v12  ;;  %v1287_v4 = vrot.slane %v1286_v18, 4  ;;  %v1537_v57 = vrot.slane %v1536_v3, 4  ;;  %v1549_v46 = vshll.u32 %v4406_v55, 16  ;;  %v4496_v55 = vld [vmem:[#allocation2 + $0x68] sm:$0x1] }
 0x18a   : > { %2398 = vrot.lane.b32.xlu0 %v3137_v19, %s3443_s20  ;;  %v1410_v35 = vsel %vm3940_vm12, %v1408_v44, %v1409_v11  ;;  %v1541_v28 = vrot.slane %v1539_v37, 5  ;;  %v1560_v33 = vor.u32 %v4315_v34, %v4313_v25  ;;  %v1563_v61 = vshll.u32 %v4303_v23, 16  ;;  %v4513_v13 = vpop.permute.xlu0 %2322 }
 0x18b   : > { %v1292_v27 = vsel %vm4094_vm10, %v1287_v4, %v1291_v24  ;;  %v3091_v54 = vcombine.low %v1407_v43, %v1410_v35  ;;  %v1551_v26 = vrot.slane %v1549_v46, 5  ;;  %v1569_v7 = vrot.slane %v1567_v48, 4 }
 0x18c   : > { %v3084_v41 = vcombine.low %v1282_v31, %v1292_v27  ;;  %v1542_v17 = vsel %vm4094_vm10, %v1537_v57, %v1541_v28  ;;  %v1546_v20 = vor.u32 %v1545_v5, %v1541_v28  ;;  %v1561_v60 = vrot.slane %v1560_v33, 4 }
 0x18d   : > { %v1565_v58 = vrot.slane %v1563_v61, 5  ;;  %v1573_v25 = vshll.u32 %v4417_v52, 16  ;;  %v1632_v34 = vor.u32 %v4178_v63, %v4174_v59  ;;  %v1635_v15 = vshll.u32 %v4160_v45, 16 }
 0x18e   : > { %2108 = vrot.lane.b32.xlu1 %v3084_v41, %s3445_s22  ;;  %2146 = vrot.lane.b32.xlu0 %v3091_v54, %s3441_s18  ;;  %v1547_v23 = vrot.slane %v1546_v20, 4  ;;  %v1641_v48 = vrot.slane %v1639_v39, 4  ;;  %v1645_v19 = vshll.u32 %v4496_v55, 16  ;;  %v1817_v52 = vor.u32 %v4373_v53, %v4371_v30  ;;  %v4544_v41 = vld [vmem:[#allocation2 + $0x5c] sm:$0x1] }
 0x18f   : > { %v1566_v59 = vsel %vm4094_vm10, %v1561_v60, %v1565_v58  ;;  %v1570_v63 = vor.u32 %v1569_v7, %v1565_v58  ;;  %v1575_v12 = vrot.slane %v1573_v25, 5  ;;  %v1633_v10 = vrot.slane %v1632_v34, 4  ;;  %v3387_v25 = vld [vmem:[#allocation2 + $0x58] sm:$0xf] }
 0x190   : > { %v1552_v24 = vsel %vm4094_vm10, %v1547_v23, %v1551_v26  ;;  %v1637_v32 = vrot.slane %v1635_v15, 5  ;;  %v1647_v39 = vrot.slane %v1645_v19, 5  ;;  %v1818_v11 = vrot.slane %v1817_v52, 4  ;;  %v4535_v28 = vpop.permute.xlu0 %2266  ;;  %v1656_v15 = vld [vmem:[#allocation2 + $0x60] sm:$0xe] }
 0x191   : > { %v3106_v47 = vcombine.low %v1542_v17, %v1552_v24  ;;  %v1571_v38 = vrot.slane %v1570_v63, 4  ;;  %v1820_v30 = vshll.u32 %v4346_v42, 16  ;;  %v1826_v53 = vrot.slane %v1824_v8, 4  ;;  %v4533_v42 = vpop.permute.xlu1 %2140 }
 0x192   : > { %v1638_v18 = vsel %vm4094_vm10, %v1633_v10, %v1637_v32  ;;  %v1642_v3 = vor.u32 %v1641_v48, %v1637_v32  ;;  %v1830_v43 = vshll.u32 %v4432_v9, 16  ;;  %v1246_v44 = vshrl.u32 %v4517_v40, 16 }
 0x193   : > { %2232 = vrot.lane.b32.xlu1 %v3106_v47, %s3446_s23  ;;  %v1576_v37 = vsel %vm4094_vm10, %v1571_v38, %v1575_v12  ;;  %v1822_v5 = vrot.slane %v1820_v30, 5  ;;  %v1249_v31 = vshll.u32 %v4517_v40, 16  ;;  %v1255_v4 = vshll.u32 %v4464_v51, 16  ;;  %v4561_v38 = vld [vmem:[#allocation2 + $0x6c] sm:$0xf] }
 0x194   : > { %v3107_v8 = vcombine.low %v1566_v59, %v1576_v37  ;;  %v1643_v57 = vrot.slane %v1642_v3, 4  ;;  %v1832_v46 = vrot.slane %v1830_v43, 5  ;;  %v1248_v35 = vrot.slane %v1246_v44, 4  ;;  %v1655_v43 = vld [vmem:[#allocation2 + $0x54] sm:$0xe] }
 0x195   : > { %v1823_v9 = vsel %vm4094_vm10, %v1818_v11, %v1822_v5  ;;  %v1827_v33 = vor.u32 %v1826_v53, %v1822_v5  ;;  %v1251_v61 = vrot.slane %v1249_v31, 5  ;;  %v1257_v27 = vrot.slane %v1255_v4, 5  ;;  %v4557_v11 = vpop.permute.xlu0 %2404 }
 0x196   : > { %2234 = vrot.lane.b32.xlu0 %v3107_v8, %s3446_s23  ;;  %v1648_v54 = vsel %vm4094_vm10, %v1643_v57, %v1647_v39  ;;  %v1259_v26 = vshrl.u32 %v4464_v51, 16  ;;  %v1265_v7 = vshll.u32 %v4459_v6, 16  ;;  %v1608_v17 = vor.u32 %v3927_v36, %v3925_v49  ;;  %v4554_v36 = vpop.permute.xlu1 %2152  ;;  %v4573_v8 = vld [vmem:[#allocation2 + $0x70] sm:$0xf] }
 0x197   : > { %v3110_v20 = vcombine.low %v1638_v18, %v1648_v54  ;;  %v1828_v60 = vrot.slane %v1827_v33, 4  ;;  %v1252_v58 = vor.u32 %v1251_v61, %v1248_v35  ;;  %v1611_v34 = vshll.u32 %v3387_v25, 16 }
 0x198   : > { %v1261_v23 = vrot.slane %v1259_v26, 4  ;;  %v1267_v48 = vrot.slane %v1265_v7, 5  ;;  %v1609_v19 = vrot.slane %v1608_v17, 4  ;;  %v4941_v52 = vshrl.u32 %v3913_v14, 16 }
 0x199   : > { %2240 = vrot.lane.b32.xlu1 %v3110_v20, %s3446_s23  ;;  %v1833_v6 = vsel %vm4094_vm10, %v1828_v60, %v1832_v46  ;;  %v1253_v63 = vrot.slane %v1252_v58, 4  ;;  %v1613_v12 = vrot.slane %v1611_v34, 5  ;;  %v1621_v49 = vshll.u32 %v4544_v41, 16  ;;  %v4584_v60 = vpop.permute.xlu0 %2402 }
 0x19a   : > { %v1617_v59 = vrot.slane %v4941_v52, 4  ;;  %v3129_v10 = vcombine.low %v1823_v9, %v1833_v6  ;;  %v1262_v24 = vor.u32 %v1261_v23, %v1257_v27  ;;  %v3062_v32 = vrot.slane %v1656_v15, 9  ;;  %v4582_v54 = vpop.permute.xlu1 %2138  ;;  %v1761_v23 = vld [vmem:[#allocation2 + $0x74] sm:$0x1] }
 0x19b   : > { %v1732_v39 = vrot.slane %v4160_v45, 5  ;;  %v1258_v14 = vsel %vm4094_vm10, %v1253_v63, %v1257_v27  ;;  %v1614_v53 = vsel %vm4094_vm10, %v1609_v19, %v1613_v12  ;;  %v1735_v3 = vrot.slane %v4496_v55, 5  ;;  %v1750_v55 = vld [vmem:[#allocation2 + $0x60] sm:$0xf]  ;;  %v4580_v27 = vld [vmem:[#allocation2 + $0x64] sm:$0xf] }
 0x19c   : > { %v1618_v47 = vor.u32 %v1617_v59, %v1613_v12  ;;  %2358 = vrot.lane.b32.xlu0 %v3129_v10, %s3444_s21  ;;  %v1263_v30 = vrot.slane %v1262_v24, 4  ;;  %v1623_v45 = vrot.slane %v1621_v49, 5  ;;  %v1725_v5 = vrot.slane %v3387_v25, 5  ;;  %v1760_v59 = vld [vmem:[#allocation2 + $0x68] sm:$0x1] }
 0x19d   : > { %v1734_v18 = vrot.slane %v1732_v39, 4  ;;  %v1733_v37 = vsel %vm3940_vm12, %v3062_v32, %v1732_v39  ;;  %v1931_v57 = vshrl.u32 %v4561_v38, 16  ;;  %v1934_v46 = vshll.u32 %v4561_v38, 16 }
 0x19e   : > { %v1619_v44 = vrot.slane %v1618_v47, 4  ;;  %v1268_v31 = vsel %vm4094_vm10, %v1263_v30, %v1267_v48  ;;  %v3061_v33 = vrot.slane %v1655_v43, 9  ;;  %v1728_v61 = vrot.slane %v4544_v41, 5 }
 0x19f   : > { %v1736_v4 = vsel %vm3940_vm12, %v1734_v18, %v1735_v3  ;;  %v3083_v35 = vcombine.low %v1258_v14, %v1268_v31  ;;  %v1727_v7 = vrot.slane %v1725_v5, 4  ;;  %v1933_v17 = vrot.slane %v1931_v57, 4  ;;  %v1961_v18 = vld [vmem:[#allocation2 + $0x6c] sm:$0xe]  ;;  %v4597_v3 = vpop.permute.xlu1 %2276 }
 0x1a0   : > { %v1624_v9 = vsel %vm4094_vm10, %v1619_v44, %v1623_v45  ;;  %v1936_v20 = vrot.slane %v1934_v46, 5  ;;  %v3118_v58 = vcombine.low %v1733_v37, %v1736_v4  ;;  %v1944_v25 = vshrl.u32 %v4573_v8, 16  ;;  %v4603_v37 = vpop.permute.xlu0 %2150  ;;  %v1960_v46 = vld [vmem:[#allocation2 + $0x60] sm:$0xe] }
 0x1a1   : > { %v3109_v26 = vcombine.low %v1614_v53, %v1624_v9  ;;  %2106 = vrot.lane.b32.xlu1 %v3083_v35, %s3445_s22  ;;  %v1907_v34 = vshrl.u32 %v1750_v55, 16  ;;  %v1910_v15 = vshll.u32 %v1750_v55, 16  ;;  %v1726_v41 = vsel %vm3940_vm12, %v3061_v33, %v1725_v5 }
 0x1a2   : > { %v1729_v48 = vsel %vm3940_vm12, %v1727_v7, %v1728_v61  ;;  %v1920_v19 = vshrl.u32 %v4580_v27, 16  ;;  %v1937_v52 = vor.u32 %v1936_v20, %v1933_v17  ;;  %v1940_v49 = vshll.u32 %v4573_v8, 16 }
 0x1a3   : > { %2238 = vrot.lane.b32.xlu0 %v3109_v26, %s3446_s23  ;;  %v3117_v6 = vcombine.low %v1726_v41, %v1729_v48  ;;  %v1909_v63 = vrot.slane %v1907_v34, 4  ;;  %v1912_v12 = vrot.slane %v1910_v15, 5  ;;  %v1946_v24 = vrot.slane %v1944_v25, 4  ;;  %v4615_v15 = vpop.permute.xlu1 %2316  ;;  %s3010_s23 = sshll.u32 %s4961_s10, 5 }
 0x1a4   : > { %v1938_v10 = vrot.slane %v1937_v52, 4  ;;  %v1950_v32 = vshll.u32 %v1761_v23, 16  ;;  %v1916_v39 = vshll.u32 %v4580_v27, 16  ;;  %v1942_v14 = vrot.slane %v1940_v49, 5  ;;  %v4622_v48 = vpop.permute.xlu0 %2190  ;;  %v3160_v49 = vld [vmem:[%s3547_s25 + $0x18] sm:$0xff] }
 0x1a5   : > { %2280 = vrot.lane.b32.xlu1 %v3118_v58, %s3442_s19  ;;  %v1913_v47 = vor.u32 %v1912_v12, %v1909_v63  ;;  %v1922_v30 = vrot.slane %v1920_v19, 4  ;;  %v1926_v53 = vshll.u32 %v1760_v59, 16  ;;  %v3126_v43 = vcombine.low %v4561_v38, %v4573_v8  ;;  %v3159_v63 = vld [vmem:[%s3547_s25 + $0x10] sm:$0xff] }
 0x1a6   : > { %v1918_v44 = vrot.slane %v1916_v39, 5  ;;  %v2037_v45 = vrot.slane %v4573_v8, 5  ;;  %v3125_v5 = vcombine.low %v1750_v55, %v4580_v27  ;;  %v1947_v31 = vor.u32 %v1946_v24, %v1942_v14  ;;  %v3162_v24 = vld [vmem:[%s3547_s25 + $0x28] sm:$0xff]  ;;  %v3163_v39 = vld [vmem:[%s3547_s25 + $0x30] sm:$0xff] }
 0x1a7   : > { %2278 = vrot.lane.b32.xlu0 %v3117_v6, %s3442_s19  ;;  %v1952_v4 = vrot.slane %v1950_v32, 5  ;;  %v1914_v57 = vrot.slane %v1913_v47, 4  ;;  %v1943_v35 = vsel %vm4094_vm10, %v1938_v10, %v1942_v14  ;;  %v1928_v33 = vrot.slane %v1926_v53, 5  ;;  %v3379_v6 = vld [vmem:[%s4901_s5 + $0x18] sm:$0xff]   ;;  %v3161_v10 = vld [vmem:[%s3547_s25 + $0x20] sm:$0xff] }
 0x1a8   : > { %v1923_v9 = vor.u32 %v1922_v30, %v1918_v44  ;;  %v3070_v61 = vrot.slane %v1961_v18, 9  ;;  %v1948_v38 = vrot.slane %v1947_v31, 4  ;;  %v2039_v26 = vrot.slane %v2037_v45, 4  ;;  %v3164_v14 = vld [vmem:[%s3547_s25 + $0x38] sm:$0xff] }
 0x1a9   : > { %2328 = vrot.lane.b32.xlu1 %v3126_v43, %s3439_s30  ;;  %v2040_v7 = vrot.slane %v1761_v23, 5  ;;  %v2030_v8 = vrot.slane %v4580_v27, 5  ;;  %v1919_v55 = vsel %vm4094_vm10, %v1914_v57, %v1918_v44  ;;  %v3069_v20 = vrot.slane %v1960_v46, 9  ;;  %v3378_v27 = vld [vmem:[%s4901_s5 + $0x20] ss:$0 sps:$4 sm:$0xff]   ;;  %v3166_v46 = vld [vmem:[%s3547_s25 + $0x48] sm:$0xff] }
 0x1aa   : > { %v1924_v17 = vrot.slane %v1923_v9, 4  ;;  %v2033_v58 = vrot.slane %v1760_v59, 5  ;;  %v1953_v25 = vsel %vm4094_vm10, %v1948_v38, %v1952_v4  ;;  %v2038_v52 = vsel %vm3940_vm12, %v3070_v61, %v2037_v45  ;;  %v3382_v4 = vld [vmem:[%s4901_s5 + $0x8] sm:$0xff]   ;;  %v3165_v57 = vld [vmem:[%s3547_s25 + $0x40] sm:$0xff]  ;;  %v3389_v9 = vld [vmem:[#allocation2 + $0x54] sm:$0xf] }
 0x1ab   : > { %2326 = vrot.lane.b32.xlu0 %v3125_v5, %s3439_s30  ;;  %v2032_v34 = vrot.slane %v2030_v8, 4  ;;  %v3134_v23 = vcombine.low %v1943_v35, %v1953_v25  ;;  %v2041_v59 = vsel %vm3940_vm12, %v2039_v26, %v2040_v7  ;;  %v2031_v21 = vsel %vm3940_vm12, %v3069_v20, %v2030_v8  ;;  %v4645_v18 = vpop.permute.xlu1 %2364  ;;  %v3388_v35 = vld [vmem:[#allocation2 + $0x58] sm:$0xf]  ;;  %v3167_v61 = vld [vmem:[%s3547_s25 + $0x50] sm:$0xff]  ;;  %v3383_v20 = vld [vmem:[%s4901_s5] sm:$0xff]  }
 0x1ac   : > { %v1929_v41 = vsel %vm4094_vm10, %v1924_v17, %v1928_v33  ;;  %vm2614_vm5 = vcmask 1043456   ;;  %v3142_v47 = vcombine.low %v2038_v52, %v2041_v59  ;;  %v2775_v30 = vsel %vm505_vm0, %v4353_v2, 0  ;;  %v3168_v38 = vld [vmem:[%s3547_s25 + $0x58] sm:$0xff] }
 0x1ad   : > { %v3133_v19 = vcombine.low %v1919_v55, %v1929_v41  ;;  %2368 = vrot.lane.b32.xlu1 %v3134_v23, %s3444_s21  ;;  %v2034_v12 = vsel %vm3940_vm12, %v2032_v34, %v2033_v58  ;;  %3311 = vmatprep.subr.msk.bf16.mxu1 %vm2614_vm5, %v3378_v27  ;;  %v2616_v32 = vsel %vm2614_vm5, %v3378_v27, 0  ;;  %v2734_v43 = vpack.c.bf16 %v3160_v49, %v3159_v63  ;;  %v3169_v27 = vld [vmem:[%s3547_s25 + $0x60] sm:$0xff]  ;;  %v3170_v23 = vld [vmem:[%s3547_s25 + $0x68] sm:$0xff]  ;;  %v3171_v41 = vld [vmem:[%s3547_s25 + $0x70] sm:$0xff] }
 0x1ae   : > { %3264 = vmatpush3.bf16.msra.mxu1 %v2616_v32  ;;  %v3141_v53 = vcombine.low %v2031_v21, %v2034_v12  ;;  %3290 = vmatpush3.bf16.msra.mxu0 %v2775_v30  ;;  %v2735_v44 = vpack.c.bf16 %v3162_v24, %v3161_v10  ;;  %v3076_v2 = vcombine.low %v4438_v62, %v4394_v16  ;;  %vm4942_vm0 = vcmask 31744   ;;  %v3390_v63 = vld [vmem:[#allocation2 + $0x4] sm:$0xf]  ;;  %v3391_v21 = vld [vmem:[#allocation2] sm:$0xf] }
 0x1af   : > { %2366 = vrot.lane.b32.xlu0 %v3133_v19, %s3444_s21  ;;  %3265 = vmatprep.subr.bf16.mxu1 %v3379_v6  ;;  %v2736_v5 = vpack.c.bf16 %v3164_v14, %v3163_v39  ;;  %v3075_v31 = vcombine.low %v4517_v40, %v4464_v51  ;;  %vm4943_vm2 = vmmov %vm4942_vm0  ;;  %vm2410_vm14 = vcmask 64512   ;;  %v3078_v33 = vcombine.low %v3389_v9, %v3388_v35  ;;  %v3172_v19 = vld [vmem:[%s3547_s25 + $0x78] sm:$0xff]  ;;  %v3173_v39 = vld [vmem:[%s3547_s25 + $0x80] sm:$0xff] }
 0x1b0   : > { %3291 = vmatprep.mubr.msk.bf16.mxu0 %vm4942_vm0, %v2734_v43  ;;  %vm4944_vm4 = vmmov %vm4942_vm0  ;;  %vm2435_vm11 = vcmask 130048   ;;  %v2737_v55 = vpack.c.bf16 %v3166_v46, %v3165_v57  ;;  %v2738_v58 = vpack.c.bf16 %v3168_v38, %v3167_v61  ;;  %vm2452_vm13 = vcmask 195584   ;;  %v3174_v14 = vld [vmem:[%s3547_s25 + $0x88] sm:$0xff]  ;;  %s3009_s25 = sshll.u32 %s4963_s28, 1 }
 0x1b1   : > { %2408 = vrot.lane.b32.xlu1 %v3142_v47, %s3443_s20  ;;  %3292 = vmatmul.mubr.msk.bf16.vlgmr.msra.gmra.mxu0 %vm4943_vm2, %v2735_v44  ;;  %vm4945_vm12 = vmmov %vm4942_vm0  ;;  %v2739_v59 = vpack.c.bf16 %v3170_v23, %v3169_v27  ;;  %v3071_v12 = vcombine.low %v3391_v21, %v3390_v63  ;;  %vm2469_vm15 = vcmask 261120   ;;  %vm2486_vm6 = vcmask 326656   ;;  %v3392_v30 = vld [vmem:[#allocation2 + $0x4c] sm:$0xf]  ;;  %s354_s24 = sadd.s32 %s3010_s23, %s3009_s25 }
 0x1b2   : > { %v4651_v45 = vpop.permute.xlu0 %2100  ;;  %3266 = vmatpush3.bf16.msra.mxu1 %v3379_v6  ;;  %3295 = vmatprep.mubr.msk.bf16.mxu0 %vm4944_vm4, %v2736_v5  ;;  %vm4946_vm3 = vmmov %vm4942_vm0  ;;  %v2740_v6 = vpack.c.bf16 %v3172_v19, %v3171_v41  ;;  %vm2503_vm9 = vcmask 392192   ;;  %vm2520_vm10 = vcmask 457728   ;;  %vm2537_vm5 = vcmask 523264   ;;  %s3011_s30 = sshll.u32 %s354_s24, 3 }
 0x1b3   : > { %2406 = vrot.lane.b32.xlu0 %v3141_v53, %s3443_s20  ;;  %3267 = vmatprep.subr.bf16.mxu1 %v3381_v56  ;;  %vm4947_vm1 = vmmov %vm4942_vm0  ;;  %v3393_v53 = vld [vmem:[#allocation2 + $0x48] sm:$0xf]  ;;  %s4818_s17 = scalar_lea.vmem %s4905_s9, %s3011_s30 }
 0x1b4   : > { %vm4948_vm7 = vmmov %vm4942_vm0 }
 0x1b5   : > { %vm4949_vm8 = vmmov %vm4942_vm0  ;;  %vm2597_vm0 = vcmask 588800  }
 0x1b6   : > { %v2113_v26 = vpop.permute.xlu1 %2112  ;;  %v2227_v7 = vpop.permute.xlu0 %2226  ;;  %3268 = vmatpush3.bf16.msra.mxu1 %v3381_v56  ;;  %v3077_v56 = vcombine.low %v3393_v53, %v3392_v30  ;;  %v3396_v53 = vld [vmem:[#allocation2 + $0x1c] sm:$0xf] }
 0x1b7   : > { %v2434_v8 = vsel %vm2410_vm14, %v3078_v33, %v2113_v26  ;;  %3269 = vmatprep.subr.bf16.mxu1 %v3382_v4 }
 0x1b8   : > { %v2451_v17 = vsel %vm2435_vm11, %v2434_v8, %v4554_v36 }
 0x1b9   : > { %3296 = vmatmul.mubr.msk.bf16.gmra.mxu0 %vm4945_vm12, %v2737_v55 }
 0x1ba   : > { %v2189_v25 = vpop.permute.xlu1 %2188  ;;  %3270 = vmatpush3.bf16.msra.mxu1 %v3382_v4  ;;  %v4675_v34 = vpop.permute.xlu0 %2314  ;;  %3299 = vmatprep.mubr.msk.bf16.mxu0 %vm4946_vm3, %v2738_v58 }
 0x1bb   : > { %3271 = vmatprep.subr.bf16.mxu1 %v3383_v20 }
 0x1be   : > { %v2201_v36 = vpop.permute.xlu1 %2200  ;;  %3272 = vmatpush3.bf16.msra.mxu1 %v3383_v20 }
 0x1bf   : > { %v4683_v52 = vsel %vm2452_vm13, %v2451_v17, %v2201_v36  ;;  %v3395_v17 = vld [vmem:[#allocation2 + $0xc] sm:$0xf] }
 0x1c1   : > { %3300 = vmatmul.mubr.msk.bf16.gmra.mxu0 %vm4947_vm1, %v2739_v59 }
 0x1c2   : > { %v4685_v49 = vpop.permute.xlu1 %2236  ;;  %3303 = vmatprep.mubr.msk.bf16.mxu0 %vm4948_vm7, %v2740_v6 }
 0x1c3   : > { %v2099_v10 = vpop.permute.xlu0 %2098 }
 0x1c4   : > { %v2413_v24 = vsel %vm2410_vm14, %v3071_v12, %v2099_v10 }
 0x1c5   : > { %v2437_v32 = vsel %vm2435_vm11, %v2413_v24, %v4582_v54  ;;  %v2741_v54 = vpack.c.bf16 %v3174_v14, %v3173_v39 }
 0x1c6   : > { %v2454_v47 = vsel %vm2452_vm13, %v2437_v32, %v4454_v50  ;;  %v2111_v43 = vpop.permute.xlu1 %2110 }
 0x1c7   : > { %v2471_v44 = vsel %vm2469_vm15, %v2454_v47, %v2227_v7  ;;  %v2431_v5 = vsel %vm2410_vm14, %v3077_v56, %v2111_v43  ;;  %v3397_v56 = vld [vmem:[#allocation2 + $0x28] sm:$0xf]  ;;  %v3398_v43 = vld [vmem:[#allocation2 + $0x24] sm:$0xf] }
 0x1c8   : > { %v2488_v4 = vsel %vm2486_vm6, %v2471_v44, %v4535_v28  ;;  %v2449_v57 = vsel %vm2435_vm11, %v2431_v5, %v4603_v37  ;;  %v3394_v37 = vld [vmem:[#allocation2 + $0x10] sm:$0xf]  ;;  %v3074_v44 = vcombine.low %v3398_v43, %v3397_v56  ;;  %v4810_v56 = vld [vmem:[%s4902_s6] ss:$0 sm:$0xff] }
 0x1c9   : > { %v4704_v46 = vsel %vm2452_vm13, %v2449_v57, %v4480_v22  ;;  %3304 = vmatmul.mubr.msk.bf16.gmra.mxu0 %vm4949_vm8, %v2741_v54  ;;  %v3072_v22 = vcombine.low %v3395_v17, %v3394_v37 }
 0x1ca   : > { %v2145_v35 = vpop.permute.xlu1 %2144 }
 0x1cb   : > { %v4706_v50 = vpop.permute.xlu0 %2362  ;;  %v2416_v20 = vsel %vm2410_vm14, %v3072_v22, %v4651_v45 }
 0x1cc   : > { %v2439_v23 = vsel %vm2435_vm11, %v2416_v20, %v4533_v42  ;;  %v2505_v42 = vsel %vm2503_vm9, %v2488_v4, %v4675_v34  ;;  %v3073_v34 = vcombine.low %v4358_v29, %v3396_v53 }
 0x1cd   : > { %v2456_v41 = vsel %vm2452_vm13, %v2439_v23, %v2189_v25 }
 0x1ce   : > { %v2269_v33 = vpop.permute.xlu1 %2268 }
 0x1cf   : > { %v2397_v9 = vpop.permute.xlu0 %2396 }
 0x1d2   : > { %v2321_v38 = vpop.permute.xlu1 %2320 }
 0x1d3   : > { %v4709_v61 = vpop.permute.xlu0 %2270 }
 0x1d7   : > { %v2395_v26 = vpop.permute.xlu0 %2394 }
 0x1d9   : > { %v2357_v28 = vpop.permute.xlu1 %2356 }
 0x1db   : > { %v2143_v7 = vpop.permute.xlu0 %2142 }
 0x1df   : > { %v2105_v8 = vpop.permute.xlu1 %2104  ;;  %v4711_v55 = vpop.permute.xlu0 %2194 }
 0x1e0   : > { %v2422_v54 = vsel %vm2410_vm14, %v3074_v44, %v2105_v8 }
 0x1e3   : > { %v2193_v58 = vpop.permute.xlu1 %2192 }
 0x1e5   : > { %v2231_v27 = vpop.permute.xlu0 %2230 }
 0x1e7   : > { %v2229_v19 = vpop.permute.xlu1 %2228 }
 0x1e8   : > { %v2473_v36 = vsel %vm2469_vm15, %v2456_v41, %v2229_v19 }
 0x1e9   : > { %v2490_v59 = vsel %vm2486_vm6, %v2473_v36, %v2269_v33  ;;  %v2319_v6 = vpop.permute.xlu0 %2318 }
 0x1ea   : > { %v2507_v63 = vsel %vm2503_vm9, %v2490_v59, %v4615_v15 }
 0x1eb   : > { %v2524_v45 = vsel %vm2520_vm10, %v2507_v63, %v2357_v28  ;;  %v2443_v28 = vsel %vm2435_vm11, %v2422_v54, %v2145_v35 }
 0x1ec   : > { %v2541_v32 = vsel %vm2537_vm5, %v2524_v45, %v2397_v9  ;;  %v2460_v8 = vsel %vm2452_vm13, %v2443_v28, %v2193_v58 }
 0x1ed   : > { %v2103_v21 = vpop.permute.xlu1 %2102 }
 0x1ee   : > { %v2419_v5 = vsel %vm2410_vm14, %v3073_v34, %v2103_v21  ;;  %v4805_v34 = vld [vmem:[%s4904_s8] ss:$0 sm:$0xff] }
 0x1ef   : > { %v2441_v9 = vsel %vm2435_vm11, %v2419_v5, %v2143_v7 }
 0x1f0   : > { %v2355_v12 = vpop.permute.xlu0 %2354  ;;  %v2458_v16 = vsel %vm2452_vm13, %v2441_v9, %v4622_v48 }
 0x1f1   : > { %v2522_v25 = vsel %vm2520_vm10, %v2505_v42, %v2355_v12  ;;  %v2149_v10 = vpop.permute.xlu1 %2148  ;;  %v2475_v22 = vsel %vm2469_vm15, %v2458_v16, %v2231_v27 }
 0x1f2   : > { %v2539_v24 = vsel %vm2537_vm5, %v2522_v25, %v2395_v26  ;;  %v2492_v35 = vsel %vm2486_vm6, %v2475_v22, %v4709_v61 }
 0x1f3   : > { %3273 = vmatprep.mubr.msk.bf16.mxu1 %vm2597_vm0, %v2539_v24 }
 0x1f4   : > { %3274 = vmatmul.mubr.msk.bf16.vlgmr.msra.gmra.mxu1 %vm2597_vm0, %v2541_v32  ;;  %v2401_v15 = vpop.permute.xlu0 %2400 }
 0x1f5   : > { %v2273_v39 = vpop.permute.xlu1 %2272 }
 0x1f8   : > { %v2275_v14 = vpop.permute.xlu0 %2274 }
 0x1fb   : > { %v2361_v47 = vpop.permute.xlu1 %2360 }
 0x1fc   : > { %v2399_v30 = vpop.permute.xlu0 %2398 }
 0x200   : > { %v2109_v4 = vpop.permute.xlu1 %2108  ;;  %v2147_v26 = vpop.permute.xlu0 %2146 }
 0x201   : > { %v2428_v57 = vsel %vm2410_vm14, %v3076_v2, %v2109_v4 }
 0x202   : > { %v2447_v33 = vsel %vm2435_vm11, %v2428_v57, %v2149_v10 }
 0x203   : > { %v2464_v29 = vsel %vm2452_vm13, %v2447_v33, %v4504_v1 }
 0x204   : > { %v2481_v37 = vsel %vm2469_vm15, %v2464_v29, %v4685_v49  ;;  %v2509_v49 = vsel %vm2503_vm9, %v2492_v35, %v2319_v6 }
 0x205   : > { %v2233_v62 = vpop.permute.xlu1 %2232  ;;  %v2498_v61 = vsel %vm2486_vm6, %v2481_v37, %v4597_v3 }
 0x206   : > { %v2477_v2 = vsel %vm2469_vm15, %v2460_v8, %v2233_v62  ;;  %v2515_v63 = vsel %vm2503_vm9, %v2498_v61, %v4473_v0 }
 0x207   : > { %v2494_v7 = vsel %vm2486_vm6, %v2477_v2, %v2273_v39  ;;  %v2532_v40 = vsel %vm2520_vm10, %v2515_v63, %v4645_v18 }
 0x208   : > { %v2235_v17 = vpop.permute.xlu0 %2234  ;;  %v2511_v1 = vsel %vm2503_vm9, %v2494_v7, %v2321_v38  ;;  %v2549_v25 = vsel %vm2537_vm5, %v2532_v40, %v4557_v11 }
 0x209   : > { %v2528_v23 = vsel %vm2520_vm10, %v2511_v1, %v2361_v47 }
 0x20a   : > { %v2545_v19 = vsel %vm2537_vm5, %v2528_v23, %v2401_v15 }
 0x20b   : > { %v2241_v20 = vpop.permute.xlu1 %2240 }
 0x20e   : > { %v2359_v58 = vpop.permute.xlu0 %2358 }
 0x20f   : > { %v2526_v48 = vsel %vm2520_vm10, %v2509_v49, %v2359_v58 }
 0x210   : > { %v2543_v41 = vsel %vm2537_vm5, %v2526_v48, %v2399_v30 }
 0x211   : > { %3277 = vmatprep.mubr.msk.bf16.mxu1 %vm2597_vm0, %v2543_v41 }
 0x212   : > { %3278 = vmatmul.mubr.msk.bf16.gmra.mxu1 %vm2597_vm0, %v2545_v19 }
 0x213   : > { %v2107_v38 = vpop.permute.xlu1 %2106 }
 0x214   : > { %v2425_v27 = vsel %vm2410_vm14, %v3075_v31, %v2107_v38 }
 0x215   : > { %v2239_v36 = vpop.permute.xlu0 %2238  ;;  %v2445_v59 = vsel %vm2435_vm11, %v2425_v27, %v2147_v26 }
 0x216   : > { %v2462_v6 = vsel %vm2452_vm13, %v2445_v59, %v4711_v55 }
 0x217   : > { %v2479_v21 = vsel %vm2469_vm15, %v2462_v6, %v2235_v17  ;;  %v2281_v45 = vpop.permute.xlu1 %2280 }
 0x218   : > { %v2496_v3 = vsel %vm2486_vm6, %v2479_v21, %v2275_v14 }
 0x219   : > { %v2279_v42 = vpop.permute.xlu0 %2278  ;;  %v2513_v51 = vsel %vm2503_vm9, %v2496_v3, %v4513_v13  ;;  %v2485_v13 = vsel %vm2469_vm15, %v4683_v52, %v2241_v20 }
 0x21a   : > { %v2530_v31 = vsel %vm2520_vm10, %v2513_v51, %v4706_v50  ;;  %v2483_v50 = vsel %vm2469_vm15, %v4704_v46, %v2239_v36 }
 0x21b   : > { %v2329_v12 = vpop.permute.xlu1 %2328  ;;  %v2547_v55 = vsel %vm2537_vm5, %v2530_v31, %v4584_v60  ;;  %v2502_v60 = vsel %vm2486_vm6, %v2485_v13, %v2281_v45  ;;  %v2500_v24 = vsel %vm2486_vm6, %v2483_v50, %v2279_v42 }
 0x21c   : > { %3281 = vmatprep.mubr.msk.bf16.mxu1 %vm2597_vm0, %v2547_v55  ;;  %v2519_v32 = vsel %vm2503_vm9, %v2502_v60, %v2329_v12 }
 0x21d   : > { %v2327_v0 = vpop.permute.xlu0 %2326  ;;  %3282 = vmatmul.mubr.msk.bf16.gmra.mxu1 %vm2597_vm0, %v2549_v25 }
 0x21e   : > { %v2517_v11 = vsel %vm2503_vm9, %v2500_v24, %v2327_v0 }
 0x21f   : > { %v2369_v10 = vpop.permute.xlu1 %2368 }
 0x220   : > { %v2536_v15 = vsel %vm2520_vm10, %v2519_v32, %v2369_v10 }
 0x221   : > { %v2367_v18 = vpop.permute.xlu0 %2366 }
 0x222   : > { %v2534_v14 = vsel %vm2520_vm10, %v2517_v11, %v2367_v18 }
 0x223   : > { %v2409_v39 = vpop.permute.xlu1 %2408 }
 0x224   : > { %v2553_v52 = vsel %vm2537_vm5, %v2536_v15, %v2409_v39 }
 0x225   : > { %v2407_v47 = vpop.permute.xlu0 %2406 }
 0x226   : > { %v2551_v30 = vsel %vm2537_vm5, %v2534_v14, %v2407_v47 }
 0x227   : > { %3285 = vmatprep.mubr.msk.bf16.mxu1 %vm2597_vm0, %v2551_v30 }
 0x228   : > { %3286 = vmatmul.mubr.msk.bf16.gmra.mxu1 %vm2597_vm0, %v2553_v52 }
 0x271   : > { %v3293_v46 = vpop.f32.mrf.mxu0 }
 0x272   : > { %v2820_v44 = vadd.f32 %v3293_v46, %v4805_v34 }
 0x273   : > { %v2811_v53 = vpop.f32.mrf.mxu0 }
 0x274   : > { %v2812_v54 = vadd.f32 %v4805_v34, %v2811_v53 }
 0x275   : > { %v3294_v43 = vpop.f32.mrf.mxu0 }
 0x276   : > { %v2823_v29 = vadd.f32 %v3294_v43, %v4805_v34 }
 0x277   : > { %v2814_v9 = vpop.f32.mrf.mxu0 }
 0x278   : > { %v2815_v16 = vadd.f32 %v4805_v34, %v2814_v9 }
 0x279   : > { %v3297_v22 = vpop.f32.mrf.mxu0 }
 0x27a   : > { %v2836_v58 = vadd.f32 %v3297_v22, %v4805_v34 }
 0x27b   : > { %v2827_v1 = vpop.f32.mrf.mxu0 }
 0x27c   : > { %v2828_v48 = vadd.f32 %v4805_v34, %v2827_v1 }
 0x27d   : > { %v3298_v35 = vpop.f32.mrf.mxu0 }
 0x27e   : > { %v2839_v27 = vadd.f32 %v3298_v35, %v4805_v34 }
 0x27f   : > { %v2830_v20 = vpop.f32.mrf.mxu0 }
 0x280   : > { %v2831_v42 = vadd.f32 %v4805_v34, %v2830_v20 }
 0x281   : > { %v3301_v49 = vpop.f32.mrf.mxu0 }
 0x282   : > { %v2852_v31 = vadd.f32 %v3301_v49, %v4805_v34 }
 0x283   : > { %v2843_v38 = vpop.f32.mrf.mxu0 }
 0x284   : > { %v2844_v0 = vadd.f32 %v4805_v34, %v2843_v38 }
 0x285   : > { %v3302_v45 = vpop.f32.mrf.mxu0 }
 0x286   : > { %v2855_v24 = vadd.f32 %v3302_v45, %v4805_v34 }
 0x287   : > { %v2846_v12 = vpop.f32.mrf.mxu0 }
 0x288   : > { %v2847_v39 = vadd.f32 %v4805_v34, %v2846_v12 }
 0x289   : > { %v3305_v50 = vpop.f32.mrf.mxu0 }
 0x28a   : > { %v2868_v46 = vadd.f32 %v3305_v50, %v4805_v34 }
 0x28b   : > { %v2859_v52 = vpop.f32.mrf.mxu0 }
 0x28d   : > { %v3306_v53 = vpop.f32.mrf.mxu0 }
 0x28f   : > { %v2862_v9 = vpop.f32.mrf.mxu0 }
 0x2b4   : > { %v3275_v5 = vpop.f32.mrf.mxu1 }
 0x2b5   : > { %v2661_v4 = vadd.f32 %v3275_v5, %v4810_v56 }
 0x2b6   : > { %v2652_v57 = vpop.f32.mrf.mxu1 }
 0x2b7   : > { %v2876_v33 = vadd.f32 %v2820_v44, %v2661_v4  ;;  %v2653_v26 = vadd.f32 %v4810_v56, %v2652_v57  ;;  %v2860_v4 = vadd.f32 %v4805_v34, %v2859_v52 }
 0x2b8   : > { %v3276_v28 = vpop.f32.mrf.mxu1 }
 0x2b9   : > { %2892 = vst.msk [vmem:[%s4818_s17 + $0x10] sm:$0xff] %vm2410_vm14, %v2876_v33  ;;  %v2874_v37 = vadd.f32 %v2812_v54, %v2653_v26  ;;  %v2664_v8 = vadd.f32 %v3276_v28, %v4810_v56  ;;  %v2871_v26 = vadd.f32 %v3306_v53, %v4805_v34 }
 0x2ba   : > { %v2655_v62 = vpop.f32.mrf.mxu1 }
 0x2bb   : > { %2890 = vst.msk [vmem:[%s4818_s17] sm:$0xff] %vm2410_vm14, %v2874_v37  ;;  %v2877_v2 = vadd.f32 %v2823_v29, %v2664_v8  ;;  %v2656_v7 = vadd.f32 %v4810_v56, %v2655_v62  ;;  %v2863_v8 = vadd.f32 %v4805_v34, %v2862_v9 }
 0x2bd   : > { %2893 = vst.msk [vmem:[%s4818_s17 + $0x18] sm:$0xff] %vm2410_vm14, %v2877_v2  ;;  %v2875_v17 = vadd.f32 %v2815_v16, %v2656_v7 }
 0x2bf   : > { %2891 = vst.msk [vmem:[%s4818_s17 + $0x8] sm:$0xff] %vm2410_vm14, %v2875_v17 }
 0x2d2   : > { %v3279_v23 = vpop.f32.mrf.mxu1 }
 0x2d3   : > { %v2677_v41 = vadd.f32 %v3279_v23, %v4810_v56 }
 0x2d4   : > { %v2668_v19 = vpop.f32.mrf.mxu1 }
 0x2d5   : > { %v2880_v61 = vadd.f32 %v2836_v58, %v2677_v41  ;;  %v2669_v36 = vadd.f32 %v4810_v56, %v2668_v19 }
 0x2d6   : > { %v3280_v59 = vpop.f32.mrf.mxu1 }
 0x2d7   : > { %2896 = vst.msk [vmem:[%s4818_s17 + $0x30] sm:$0xff] %vm2410_vm14, %v2880_v61  ;;  %v2878_v6 = vadd.f32 %v2828_v48, %v2669_v36  ;;  %v2680_v63 = vadd.f32 %v3280_v59, %v4810_v56 }
 0x2d8   : > { %v2671_v21 = vpop.f32.mrf.mxu1 }
 0x2d9   : > { %2894 = vst.msk [vmem:[%s4818_s17 + $0x20] sm:$0xff] %vm2410_vm14, %v2878_v6  ;;  %v2881_v3 = vadd.f32 %v2839_v27, %v2680_v63  ;;  %v2672_v51 = vadd.f32 %v4810_v56, %v2671_v21 }
 0x2db   : > { %2897 = vst.msk [vmem:[%s4818_s17 + $0x38] sm:$0xff] %vm2410_vm14, %v2881_v3  ;;  %v2879_v40 = vadd.f32 %v2831_v42, %v2672_v51 }
 0x2dd   : > { %2895 = vst.msk [vmem:[%s4818_s17 + $0x28] sm:$0xff] %vm2410_vm14, %v2879_v40  ;;  %v3283_v55 = vpop.f32.mrf.mxu1 }
 0x2de   : > { %v2693_v25 = vadd.f32 %v3283_v55, %v4810_v56 }
 0x2df   : > { %v2684_v10 = vpop.f32.mrf.mxu1 }
 0x2e0   : > { %v2884_v13 = vadd.f32 %v2852_v31, %v2693_v25  ;;  %v2685_v18 = vadd.f32 %v4810_v56, %v2684_v10 }
 0x2e1   : > { %v3284_v60 = vpop.f32.mrf.mxu1 }
 0x2e2   : > { %2900 = vst.msk [vmem:[%s4818_s17 + $0x50] sm:$0xff] %vm2410_vm14, %v2884_v13  ;;  %v2882_v32 = vadd.f32 %v2844_v0, %v2685_v18  ;;  %v2696_v11 = vadd.f32 %v3284_v60, %v4810_v56 }
 0x2e3   : > { %v2687_v15 = vpop.f32.mrf.mxu1 }
 0x2e4   : > { %2898 = vst.msk [vmem:[%s4818_s17 + $0x40] sm:$0xff] %vm2410_vm14, %v2882_v32  ;;  %v2885_v14 = vadd.f32 %v2855_v24, %v2696_v11  ;;  %v2688_v47 = vadd.f32 %v4810_v56, %v2687_v15 }
 0x2e6   : > { %2901 = vst.msk [vmem:[%s4818_s17 + $0x58] sm:$0xff] %vm2410_vm14, %v2885_v14  ;;  %v2883_v30 = vadd.f32 %v2847_v39, %v2688_v47 }
 0x2e8   : > { %2899 = vst.msk [vmem:[%s4818_s17 + $0x48] sm:$0xff] %vm2410_vm14, %v2883_v30  ;;  %v3287_v43 = vpop.f32.mrf.mxu1 }
 0x2e9   : > { %v2709_v44 = vadd.f32 %v3287_v43, %v4810_v56 }
 0x2ea   : > { %v2700_v5 = vpop.f32.mrf.mxu1 }
 0x2eb   : > { %v2888_v54 = vadd.f32 %v2868_v46, %v2709_v44  ;;  %v2701_v57 = vadd.f32 %v4810_v56, %v2700_v5 }
 0x2ec   : > { %v3288_v33 = vpop.f32.mrf.mxu1 }
 0x2ed   : > { %2904 = vst.msk [vmem:[%s4818_s17 + $0x70] sm:$0xff] %vm2410_vm14, %v2888_v54  ;;  %v2886_v29 = vadd.f32 %v2860_v4, %v2701_v57  ;;  %v2712_v28 = vadd.f32 %v3288_v33, %v4810_v56 }
 0x2ee   : > { %v2703_v37 = vpop.f32.mrf.mxu1 }
 0x2ef   : > { %2902 = vst.msk [vmem:[%s4818_s17 + $0x60] sm:$0xff] %vm2410_vm14, %v2886_v29  ;;  %v2889_v16 = vadd.f32 %v2871_v26, %v2712_v28  ;;  %v2704_v62 = vadd.f32 %v4810_v56, %v2703_v37 }
 0x2f1   : > { %2905 = vst.msk [vmem:[%s4818_s17 + $0x78] sm:$0xff] %vm2410_vm14, %v2889_v16  ;;  %v2887_v2 = vadd.f32 %v2863_v8, %v2704_v62 }
 0x2f3   : > { %2903 = vst.msk [vmem:[%s4818_s17 + $0x68] sm:$0xff] %vm2410_vm14, %v2887_v2 }
 0x2f4 PF: > { %s19_s13 = sadd.s32 1, %s3437_s13   ;;  %s4950_s30 = smov %s3429_s11 }
 0x2f5   : > { %p16_p7 = scmp.ge.s32.totalorder %s19_s13, 6   ;;  %s4951_s10 = smov %s3433_s12 }
 0x2f6   : > { %s4952_s11 = smov %s4955_s14  ;;  %s4953_s12 = smov %s4959_s15 }
 0x2f7   :  { %18 = sbr.rel (!%p16_p7) target bundleno = 3 (0x3), region = 90 }

</bundles_post_ra>
